<compile_context>
chip_gen: v7x
topology: tpu7x:2x2x1
jax: 0.10.0
libtpu: 0.0.40
codegen_flags: <defaults>
</compile_context>

<pallas_src>
import functools

import jax
import jax.numpy as jnp
from jax import lax
from jax.experimental import pallas as pl
from jax.experimental.pallas import tpu as pltpu


# ------------------------------ fused kernel --------------------------------

def _swish(v):
    return v * jax.nn.sigmoid(v)


def _mac(wT, a):
    """(Co, Ci) x (Ci, P) -> (Co, P) via Ci VPU broadcast multiply-adds.

    Contraction depth is at most in_filters (8), so we stay on the VPU instead
    of paying MXU fill/drain for a tiny matmul."""
    acc = wT[:, 0:1] * a[0:1, :]
    for c in range(1, a.shape[0]):
        acc = acc + wT[:, c:c + 1] * a[c:c + 1, :]
    return acc


def _five_csp_kernel(x_ref, mask_ref, w0_ref, b0_ref,
                     dw1_w_ref, dw1_b_ref, pw1_w_ref, pw1_b_ref,
                     dw2_w_ref, dw2_b_ref, pw2_w_ref, pw2_b_ref,
                     o_ref, *, H, W, f0, m):
    P = H * W
    x = x_ref[0].astype(jnp.float32)            # (Cin, P), pixels in lanes
    masks = mask_ref[...]                       # (8, P) edge masks (no center)
    w0 = w0_ref[...]                            # (f0, Cin), BN scale folded
    b0 = b0_ref[...]                            # (f0, 1)  BN shift

    # --- self.conv on the input ---------------------------------------------
    conv = _swish(_mac(w0, x) + b0)             # (f0, P)

    # --- static tap offsets (same order as the precomputed mask rows) -------
    taps = []                                   # (lane offset, mask row | None)
    mrow = 0
    for dy in (-1, 0, 1):
        for dx in (-1, 0, 1):
            if dy == 0 and dx == 0:
                taps.append((0, None))
            else:
                taps.append((dy * W + dx, mrow))
                mrow += 1

    def dw_pw(a, dw_w_ref, dw_b_ref, pw_w_ref, pw_b_ref):
        # 9 shifted + edge-masked copies of `a`, shared by all channel groups.
        shifted = []
        for off, mi in taps:
            if mi is None:
                shifted.append(a)
            else:
                shifted.append(pltpu.roll(a, (-off) % P, axis=1) *
                               masks[mi:mi + 1, :])
        acc = None
        for j in range(m):                      # depthwise channel multiplier
            dw_wj = dw_w_ref[j]                 # (f0, 9), BN scale folded
            d = dw_wj[:, 0:1] * shifted[0]
            for t in range(1, 9):
                d = d + dw_wj[:, t:t + 1] * shifted[t]
            d = _swish(d + dw_b_ref[j])         # DW3x3 + BN + swish (group j)
            pj = _mac(pw_w_ref[j], d)           # group-j share of the 1x1 conv
            acc = pj if acc is None else acc + pj
        return _swish(acc + pw_b_ref[...])      # 1x1 + BN + swish

    h = dw_pw(conv, dw1_w_ref, dw1_b_ref, pw1_w_ref, pw1_b_ref)
    conv5 = dw_pw(h, dw2_w_ref, dw2_b_ref, pw2_w_ref, pw2_b_ref)

    # --- self.conv(cat([conv, conv5])) without materializing the concat -----
    y = _mac(w0[:, :f0], conv) + _mac(w0[:, f0:], conv5) + b0
    o_ref[0] = _swish(y).astype(o_ref.dtype)


# --------------------------- params & forward -------------------------------

def _bn_fold(gamma, beta, mean, var, eps=1e-5):
    scale = gamma / jnp.sqrt(var + eps)
    shift = beta - mean * scale
    return scale, shift


def init_params(key, in_filters, filters_list):
    f0, f1 = filters_list
    ks = jax.random.split(key, 10)

    def bn(k, c):
        k1, k2, k3, k4 = jax.random.split(k, 4)
        gamma = 1.0 + 0.1 * jax.random.normal(k1, (c,), jnp.float32)
        beta = 0.1 * jax.random.normal(k2, (c,), jnp.float32)
        mean = 0.1 * jax.random.normal(k3, (c,), jnp.float32)
        var = jax.random.uniform(k4, (c,), jnp.float32, 0.5, 1.5)
        return _bn_fold(gamma, beta, mean, var)

    p = {}
    # self.conv : 1x1 conv in_filters -> f0 (weight stored as (Cin, Cout))
    p["conv_w"] = 0.1 * jax.random.normal(ks[0], (in_filters, f0), jnp.float32)
    p["conv_bn"] = bn(ks[1], f0)
    # conv4[0] : Conv_DW 3x3, f0 -> f1, groups=f0 (weight stored as (3,3,Cout))
    p["dw1_w"] = 0.1 * jax.random.normal(ks[2], (3, 3, f1), jnp.float32)
    p["dw1_bn"] = bn(ks[3], f1)
    # conv4[1] : 1x1 f1 -> f0
    p["pw1_w"] = 0.1 * jax.random.normal(ks[4], (f1, f0), jnp.float32)
    p["pw1_bn"] = bn(ks[5], f0)
    # conv4[2] : Conv_DW 3x3, f0 -> f1
    p["dw2_w"] = 0.1 * jax.random.normal(ks[6], (3, 3, f1), jnp.float32)
    p["dw2_bn"] = bn(ks[7], f1)
    # conv4[3] : 1x1 f1 -> f0
    p["pw2_w"] = 0.1 * jax.random.normal(ks[8], (f1, f0), jnp.float32)
    p["pw2_bn"] = bn(ks[9], f0)
    return p


def _edge_masks(H, W):
    """Zero-pad validity masks for the 8 non-center 3x3 taps, shape (8, H*W)."""
    P = H * W
    yy, xx = jnp.meshgrid(jnp.arange(H), jnp.arange(W), indexing="ij")
    yy = yy.reshape(1, P)
    xx = xx.reshape(1, P)
    rows = []
    for dy in (-1, 0, 1):
        for dx in (-1, 0, 1):
            if dy == 0 and dx == 0:
                continue
            valid = ((yy + dy >= 0) & (yy + dy < H) &
                     (xx + dx >= 0) & (xx + dx < W))
            rows.append(valid.astype(jnp.float32))
    return jnp.concatenate(rows, axis=0)          # (8, P)


def five_csp_conv_forward(params, x_nchw, filters_list, in_filters):
    f0, f1 = filters_list
    assert in_filters == 2 * f0, (
        "torch module re-uses self.conv on cat([conv, conv5]); requires "
        "in_filters == 2 * filters_list[0]")
    assert f1 % f0 == 0
    m = f1 // f0
    N, C, H, W = x_nchw.shape
    P = H * W
    x = x_nchw.reshape(N, C, P)                       # NCHW -> (N, C, H*W)
    masks = _edge_masks(H, W)                         # (8, P)

    # ----- fold BN (inference form) + group rearrangement, all outside kernel
    s0, b0 = params["conv_bn"]
    w0 = params["conv_w"].T * s0[:, None]             # (f0, Cin), scale folded
    b0c = b0.reshape(f0, 1)

    def fold_dw(w_hwo, bn):                           # (3,3,f1) depthwise
        sc, sh = bn
        wf = w_hwo.reshape(9, f1) * sc[None, :]       # fold BN scale
        wg = wf.reshape(9, f0, m).transpose(2, 1, 0)  # (m, f0, 9) group-major
        bg = sh.reshape(f0, m).T.reshape(m, f0, 1)    # (m, f0, 1)
        return wg, bg

    def fold_pw(w, bn):                               # (f1, f0) pointwise
        sc, sh = bn
        wT = w.reshape(f0, m, f0).transpose(1, 2, 0)  # (m, f0_out, f0_in)
        wT = wT * sc[None, :, None]                   # fold BN scale (out ch)
        return wT, sh.reshape(f0, 1)

    dw1_w, dw1_b = fold_dw(params["dw1_w"], params["dw1_bn"])
    pw1_w, pw1_b = fold_pw(params["pw1_w"], params["pw1_bn"])
    dw2_w, dw2_b = fold_dw(params["dw2_w"], params["dw2_bn"])
    pw2_w, pw2_b = fold_pw(params["pw2_w"], params["pw2_bn"])

    kern = functools.partial(_five_csp_kernel, H=H, W=W, f0=f0, m=m)
    const2 = lambda n: (0, 0)
    const3 = lambda n: (0, 0, 0)
    out = pl.pallas_call(
        kern,
        out_shape=jax.ShapeDtypeStruct((N, f0, P), x_nchw.dtype),
        grid=(N,),
        in_specs=[
            pl.BlockSpec((1, C, P), lambda n: (n, 0, 0)),   # x (per image)
            pl.BlockSpec((8, P), const2),                   # DW edge masks
            pl.BlockSpec((f0, C), const2),                  # w0 (scale folded)
            pl.BlockSpec((f0, 1), const2),                  # b0
            pl.BlockSpec((m, f0, 9), const3),               # dw1 weights
            pl.BlockSpec((m, f0, 1), const3),               # dw1 shift
            pl.BlockSpec((m, f0, f0), const3),              # pw1 weights
            pl.BlockSpec((f0, 1), const2),                  # pw1 shift
            pl.BlockSpec((m, f0, 9), const3),               # dw2 weights
            pl.BlockSpec((m, f0, 1), const3),               # dw2 shift
            pl.BlockSpec((m, f0, f0), const3),              # pw2 weights
            pl.BlockSpec((f0, 1), const2),                  # pw2 shift
        ],
        out_specs=pl.BlockSpec((1, f0, P), lambda n: (n, 0, 0)),
        compiler_params=pltpu.CompilerParams(
            dimension_semantics=("parallel",),              # megacore over batch
            vmem_limit_bytes=32 * 1024 * 1024),
    )(x, masks, w0, b0c, dw1_w, dw1_b, pw1_w, pw1_b,
      dw2_w, dw2_b, pw2_w, pw2_b)
    return out.reshape(N, f0, H, W)                    # (N, f0, H*W) -> NCHW


# --------------------------- pure-JAX reference ------------------------------

def _ref_forward(params, x_nchw, filters_list, in_filters):
    f0, f1 = filters_list
    x = jnp.transpose(x_nchw, (0, 2, 3, 1))

    def sw(v):
        return v * jax.nn.sigmoid(v)

    def pw(v, w, sc, sh):
        y = lax.conv_general_dilated(
            v, w.reshape(1, 1, *w.shape), (1, 1), "SAME",
            dimension_numbers=("NHWC", "HWIO", "NHWC"))
        return sw(y * sc + sh)

    def dw(v, w, sc, sh):
        cin = v.shape[-1]
        rhs = w.reshape(3, 3, 1, w.shape[-1])
        y = lax.conv_general_dilated(
            v, rhs, (1, 1), "SAME",
            dimension_numbers=("NHWC", "HWIO", "NHWC"),
            feature_group_count=cin)
        return sw(y * sc + sh)

    conv = pw(x, params["conv_w"], *params["conv_bn"])
    h = dw(conv, params["dw1_w"], *params["dw1_bn"])
    h = pw(h, params["pw1_w"], *params["pw1_bn"])
    h = dw(h, params["dw2_w"], *params["dw2_bn"])
    conv5 = pw(h, params["pw2_w"], *params["pw2_bn"])
    convs = jnp.concatenate([conv, conv5], axis=-1)
    out = pw(convs, params["conv_w"], *params["conv_bn"])
    return jnp.transpose(out, (0, 3, 1, 2))


# --------------------------------- main --------------------------------------

if __name__ == "__main__":
    in_filters = 8
    filters_list = (4, 8)          # f0=4, f1=8; in_filters = 2*f0 as required
    N, H, W = 2, 16, 16

    key = jax.random.PRNGKey(0)
    k_x, k_p = jax.random.split(key)
    x = jax.random.normal(k_x, (N, in_filters, H, W), jnp.float32)
    params = init_params(k_p, in_filters, filters_list)

    fwd = jax.jit(functools.partial(five_csp_conv_forward,
                                    filters_list=filters_list,
                                    in_filters=in_filters))
    out = jax.block_until_ready(fwd(params, x))
    assert out.shape == (N, filters_list[0], H, W), out.shape

    ref = jax.block_until_ready(_ref_forward(params, x, filters_list, in_filters))
    max_err = float(jnp.max(jnp.abs(out - ref)))
    assert max_err < 1e-4, f"mismatch vs reference: {max_err}"

    print("KERNEL_OK")
</pallas_src>

<mosaic_0001>
module attributes {stable_mosaic.version = 11 : i64} {
  func.func @_five_csp_kernel(%arg0: i32, %arg1: memref<1x8x256xf32, #tpu.memory_space<vmem>>, %arg2: memref<8x256xf32, #tpu.memory_space<vmem>>, %arg3: memref<4x8xf32, #tpu.memory_space<vmem>>, %arg4: memref<4x1xf32, #tpu.memory_space<vmem>>, %arg5: memref<2x4x9xf32, #tpu.memory_space<vmem>>, %arg6: memref<2x4x1xf32, #tpu.memory_space<vmem>>, %arg7: memref<2x4x4xf32, #tpu.memory_space<vmem>>, %arg8: memref<4x1xf32, #tpu.memory_space<vmem>>, %arg9: memref<2x4x9xf32, #tpu.memory_space<vmem>>, %arg10: memref<2x4x1xf32, #tpu.memory_space<vmem>>, %arg11: memref<2x4x4xf32, #tpu.memory_space<vmem>>, %arg12: memref<4x1xf32, #tpu.memory_space<vmem>>, %arg13: memref<1x4x256xf32, #tpu.memory_space<vmem>>) attributes {dimension_semantics = [#tpu.dimension_semantics<parallel>], iteration_bounds = array<i64: 2>, scalar_prefetch = 0 : i64, scratch_operands = 0 : i64, tpu.core_type = #tpu.core_type<tc>, window_params = [{transform_indices = @transform_0, window_bounds = array<i64: 1, 8, 256>}, {pipeline_mode = #tpu.pipeline_mode<synchronous>, transform_indices = @transform_1, window_bounds = array<i64: 8, 256>}, {pipeline_mode = #tpu.pipeline_mode<synchronous>, transform_indices = @transform_2, window_bounds = array<i64: 4, 8>}, {pipeline_mode = #tpu.pipeline_mode<synchronous>, transform_indices = @transform_3, window_bounds = array<i64: 4, 1>}, {pipeline_mode = #tpu.pipeline_mode<synchronous>, transform_indices = @transform_4, window_bounds = array<i64: 2, 4, 9>}, {pipeline_mode = #tpu.pipeline_mode<synchronous>, transform_indices = @transform_5, window_bounds = array<i64: 2, 4, 1>}, {pipeline_mode = #tpu.pipeline_mode<synchronous>, transform_indices = @transform_6, window_bounds = array<i64: 2, 4, 4>}, {pipeline_mode = #tpu.pipeline_mode<synchronous>, transform_indices = @transform_7, window_bounds = array<i64: 4, 1>}, {pipeline_mode = #tpu.pipeline_mode<synchronous>, transform_indices = @transform_8, window_bounds = array<i64: 2, 4, 9>}, {pipeline_mode = #tpu.pipeline_mode<synchronous>, transform_indices = @transform_9, window_bounds = array<i64: 2, 4, 1>}, {pipeline_mode = #tpu.pipeline_mode<synchronous>, transform_indices = @transform_10, window_bounds = array<i64: 2, 4, 4>}, {pipeline_mode = #tpu.pipeline_mode<synchronous>, transform_indices = @transform_11, window_bounds = array<i64: 4, 1>}, {transform_indices = @transform_12, window_bounds = array<i64: 1, 4, 256>}]} {
    %c0 = arith.constant 0 : index
    %c0_0 = arith.constant 0 : index
    %c0_1 = arith.constant 0 : index
    %0 = vector.load %arg1[%c0, %c0_0, %c0_1] : memref<1x8x256xf32, #tpu.memory_space<vmem>>, vector<1x8x256xf32>
    %1 = vector.shape_cast %0 : vector<1x8x256xf32> to vector<8x256xf32>
    %c0_2 = arith.constant 0 : index
    %c0_3 = arith.constant 0 : index
    %2 = vector.load %arg2[%c0_2, %c0_3] : memref<8x256xf32, #tpu.memory_space<vmem>>, vector<8x256xf32>
    %c0_4 = arith.constant 0 : index
    %c0_5 = arith.constant 0 : index
    %3 = vector.load %arg3[%c0_4, %c0_5] : memref<4x8xf32, #tpu.memory_space<vmem>>, vector<4x8xf32>
    %c0_6 = arith.constant 0 : index
    %c0_7 = arith.constant 0 : index
    %4 = vector.load %arg4[%c0_6, %c0_7] : memref<4x1xf32, #tpu.memory_space<vmem>>, vector<4x1xf32>
    %5 = vector.extract_strided_slice %3 {offsets = [0, 0], sizes = [4, 1], strides = [1, 1]} : vector<4x8xf32> to vector<4x1xf32>
    %6 = vector.extract_strided_slice %1 {offsets = [0, 0], sizes = [1, 256], strides = [1, 1]} : vector<8x256xf32> to vector<1x256xf32>
    %7 = vector.broadcast %5 : vector<4x1xf32> to vector<4x256xf32>
    %8 = vector.broadcast %6 : vector<1x256xf32> to vector<4x256xf32>
    %9 = arith.mulf %7, %8 : vector<4x256xf32>
    %10 = vector.extract_strided_slice %3 {offsets = [0, 1], sizes = [4, 1], strides = [1, 1]} : vector<4x8xf32> to vector<4x1xf32>
    %11 = vector.extract_strided_slice %1 {offsets = [1, 0], sizes = [1, 256], strides = [1, 1]} : vector<8x256xf32> to vector<1x256xf32>
    %12 = vector.broadcast %10 : vector<4x1xf32> to vector<4x256xf32>
    %13 = vector.broadcast %11 : vector<1x256xf32> to vector<4x256xf32>
    %14 = arith.mulf %12, %13 : vector<4x256xf32>
    %15 = arith.addf %9, %14 : vector<4x256xf32>
    %16 = vector.extract_strided_slice %3 {offsets = [0, 2], sizes = [4, 1], strides = [1, 1]} : vector<4x8xf32> to vector<4x1xf32>
    %17 = vector.extract_strided_slice %1 {offsets = [2, 0], sizes = [1, 256], strides = [1, 1]} : vector<8x256xf32> to vector<1x256xf32>
    %18 = vector.broadcast %16 : vector<4x1xf32> to vector<4x256xf32>
    %19 = vector.broadcast %17 : vector<1x256xf32> to vector<4x256xf32>
    %20 = arith.mulf %18, %19 : vector<4x256xf32>
    %21 = arith.addf %15, %20 : vector<4x256xf32>
    %22 = vector.extract_strided_slice %3 {offsets = [0, 3], sizes = [4, 1], strides = [1, 1]} : vector<4x8xf32> to vector<4x1xf32>
    %23 = vector.extract_strided_slice %1 {offsets = [3, 0], sizes = [1, 256], strides = [1, 1]} : vector<8x256xf32> to vector<1x256xf32>
    %24 = vector.broadcast %22 : vector<4x1xf32> to vector<4x256xf32>
    %25 = vector.broadcast %23 : vector<1x256xf32> to vector<4x256xf32>
    %26 = arith.mulf %24, %25 : vector<4x256xf32>
    %27 = arith.addf %21, %26 : vector<4x256xf32>
    %28 = vector.extract_strided_slice %3 {offsets = [0, 4], sizes = [4, 1], strides = [1, 1]} : vector<4x8xf32> to vector<4x1xf32>
    %29 = vector.extract_strided_slice %1 {offsets = [4, 0], sizes = [1, 256], strides = [1, 1]} : vector<8x256xf32> to vector<1x256xf32>
    %30 = vector.broadcast %28 : vector<4x1xf32> to vector<4x256xf32>
    %31 = vector.broadcast %29 : vector<1x256xf32> to vector<4x256xf32>
    %32 = arith.mulf %30, %31 : vector<4x256xf32>
    %33 = arith.addf %27, %32 : vector<4x256xf32>
    %34 = vector.extract_strided_slice %3 {offsets = [0, 5], sizes = [4, 1], strides = [1, 1]} : vector<4x8xf32> to vector<4x1xf32>
    %35 = vector.extract_strided_slice %1 {offsets = [5, 0], sizes = [1, 256], strides = [1, 1]} : vector<8x256xf32> to vector<1x256xf32>
    %36 = vector.broadcast %34 : vector<4x1xf32> to vector<4x256xf32>
    %37 = vector.broadcast %35 : vector<1x256xf32> to vector<4x256xf32>
    %38 = arith.mulf %36, %37 : vector<4x256xf32>
    %39 = arith.addf %33, %38 : vector<4x256xf32>
    %40 = vector.extract_strided_slice %3 {offsets = [0, 6], sizes = [4, 1], strides = [1, 1]} : vector<4x8xf32> to vector<4x1xf32>
    %41 = vector.extract_strided_slice %1 {offsets = [6, 0], sizes = [1, 256], strides = [1, 1]} : vector<8x256xf32> to vector<1x256xf32>
    %42 = vector.broadcast %40 : vector<4x1xf32> to vector<4x256xf32>
    %43 = vector.broadcast %41 : vector<1x256xf32> to vector<4x256xf32>
    %44 = arith.mulf %42, %43 : vector<4x256xf32>
    %45 = arith.addf %39, %44 : vector<4x256xf32>
    %46 = vector.extract_strided_slice %3 {offsets = [0, 7], sizes = [4, 1], strides = [1, 1]} : vector<4x8xf32> to vector<4x1xf32>
    %47 = vector.extract_strided_slice %1 {offsets = [7, 0], sizes = [1, 256], strides = [1, 1]} : vector<8x256xf32> to vector<1x256xf32>
    %48 = vector.broadcast %46 : vector<4x1xf32> to vector<4x256xf32>
    %49 = vector.broadcast %47 : vector<1x256xf32> to vector<4x256xf32>
    %50 = arith.mulf %48, %49 : vector<4x256xf32>
    %51 = arith.addf %45, %50 : vector<4x256xf32>
    %52 = vector.broadcast %4 : vector<4x1xf32> to vector<4x256xf32>
    %53 = arith.addf %51, %52 : vector<4x256xf32>
    %54 = arith.negf %53 : vector<4x256xf32>
    %55 = math.exp %54 : vector<4x256xf32>
    %cst = arith.constant 1.000000e+00 : f32
    %56 = vector.broadcast %cst : f32 to vector<4x256xf32>
    %57 = arith.addf %56, %55 : vector<4x256xf32>
    %58 = arith.divf %56, %57 : vector<4x256xf32>
    %59 = arith.mulf %53, %58 : vector<4x256xf32>
    %c17_i32 = arith.constant 17 : i32
    %60 = tpu.dynamic_rotate %59 by %c17_i32 dim 1 : vector<4x256xf32>, i32 -> vector<4x256xf32>
    %61 = vector.extract_strided_slice %2 {offsets = [0, 0], sizes = [1, 256], strides = [1, 1]} : vector<8x256xf32> to vector<1x256xf32>
    %62 = vector.broadcast %61 : vector<1x256xf32> to vector<4x256xf32>
    %63 = arith.mulf %60, %62 : vector<4x256xf32>
    %c16_i32 = arith.constant 16 : i32
    %64 = tpu.dynamic_rotate %59 by %c16_i32 dim 1 : vector<4x256xf32>, i32 -> vector<4x256xf32>
    %65 = vector.extract_strided_slice %2 {offsets = [1, 0], sizes = [1, 256], strides = [1, 1]} : vector<8x256xf32> to vector<1x256xf32>
    %66 = vector.broadcast %65 : vector<1x256xf32> to vector<4x256xf32>
    %67 = arith.mulf %64, %66 : vector<4x256xf32>
    %c15_i32 = arith.constant 15 : i32
    %68 = tpu.dynamic_rotate %59 by %c15_i32 dim 1 : vector<4x256xf32>, i32 -> vector<4x256xf32>
    %69 = vector.extract_strided_slice %2 {offsets = [2, 0], sizes = [1, 256], strides = [1, 1]} : vector<8x256xf32> to vector<1x256xf32>
    %70 = vector.broadcast %69 : vector<1x256xf32> to vector<4x256xf32>
    %71 = arith.mulf %68, %70 : vector<4x256xf32>
    %c1_i32 = arith.constant 1 : i32
    %72 = tpu.dynamic_rotate %59 by %c1_i32 dim 1 : vector<4x256xf32>, i32 -> vector<4x256xf32>
    %73 = vector.extract_strided_slice %2 {offsets = [3, 0], sizes = [1, 256], strides = [1, 1]} : vector<8x256xf32> to vector<1x256xf32>
    %74 = vector.broadcast %73 : vector<1x256xf32> to vector<4x256xf32>
    %75 = arith.mulf %72, %74 : vector<4x256xf32>
    %c255_i32 = arith.constant 255 : i32
    %76 = tpu.dynamic_rotate %59 by %c255_i32 dim 1 : vector<4x256xf32>, i32 -> vector<4x256xf32>
    %77 = vector.extract_strided_slice %2 {offsets = [4, 0], sizes = [1, 256], strides = [1, 1]} : vector<8x256xf32> to vector<1x256xf32>
    %78 = vector.broadcast %77 : vector<1x256xf32> to vector<4x256xf32>
    %79 = arith.mulf %76, %78 : vector<4x256xf32>
    %c241_i32 = arith.constant 241 : i32
    %80 = tpu.dynamic_rotate %59 by %c241_i32 dim 1 : vector<4x256xf32>, i32 -> vector<4x256xf32>
    %81 = vector.extract_strided_slice %2 {offsets = [5, 0], sizes = [1, 256], strides = [1, 1]} : vector<8x256xf32> to vector<1x256xf32>
    %82 = vector.broadcast %81 : vector<1x256xf32> to vector<4x256xf32>
    %83 = arith.mulf %80, %82 : vector<4x256xf32>
    %c240_i32 = arith.constant 240 : i32
    %84 = tpu.dynamic_rotate %59 by %c240_i32 dim 1 : vector<4x256xf32>, i32 -> vector<4x256xf32>
    %85 = vector.extract_strided_slice %2 {offsets = [6, 0], sizes = [1, 256], strides = [1, 1]} : vector<8x256xf32> to vector<1x256xf32>
    %86 = vector.broadcast %85 : vector<1x256xf32> to vector<4x256xf32>
    %87 = arith.mulf %84, %86 : vector<4x256xf32>
    %c239_i32 = arith.constant 239 : i32
    %88 = tpu.dynamic_rotate %59 by %c239_i32 dim 1 : vector<4x256xf32>, i32 -> vector<4x256xf32>
    %89 = vector.extract_strided_slice %2 {offsets = [7, 0], sizes = [1, 256], strides = [1, 1]} : vector<8x256xf32> to vector<1x256xf32>
    %90 = vector.broadcast %89 : vector<1x256xf32> to vector<4x256xf32>
    %91 = arith.mulf %88, %90 : vector<4x256xf32>
    %c0_8 = arith.constant 0 : index
    %c0_9 = arith.constant 0 : index
    %c0_10 = arith.constant 0 : index
    %92 = vector.load %arg5[%c0_8, %c0_9, %c0_10] : memref<2x4x9xf32, #tpu.memory_space<vmem>>, vector<1x4x9xf32>
    %93 = vector.shape_cast %92 : vector<1x4x9xf32> to vector<4x9xf32>
    %94 = vector.extract_strided_slice %93 {offsets = [0, 0], sizes = [4, 1], strides = [1, 1]} : vector<4x9xf32> to vector<4x1xf32>
    %95 = vector.broadcast %94 : vector<4x1xf32> to vector<4x256xf32>
    %96 = arith.mulf %95, %63 : vector<4x256xf32>
    %97 = vector.extract_strided_slice %93 {offsets = [0, 1], sizes = [4, 1], strides = [1, 1]} : vector<4x9xf32> to vector<4x1xf32>
    %98 = vector.broadcast %97 : vector<4x1xf32> to vector<4x256xf32>
    %99 = arith.mulf %98, %67 : vector<4x256xf32>
    %100 = arith.addf %96, %99 : vector<4x256xf32>
    %101 = vector.extract_strided_slice %93 {offsets = [0, 2], sizes = [4, 1], strides = [1, 1]} : vector<4x9xf32> to vector<4x1xf32>
    %102 = vector.broadcast %101 : vector<4x1xf32> to vector<4x256xf32>
    %103 = arith.mulf %102, %71 : vector<4x256xf32>
    %104 = arith.addf %100, %103 : vector<4x256xf32>
    %105 = vector.extract_strided_slice %93 {offsets = [0, 3], sizes = [4, 1], strides = [1, 1]} : vector<4x9xf32> to vector<4x1xf32>
    %106 = vector.broadcast %105 : vector<4x1xf32> to vector<4x256xf32>
    %107 = arith.mulf %106, %75 : vector<4x256xf32>
    %108 = arith.addf %104, %107 : vector<4x256xf32>
    %109 = vector.extract_strided_slice %93 {offsets = [0, 4], sizes = [4, 1], strides = [1, 1]} : vector<4x9xf32> to vector<4x1xf32>
    %110 = vector.broadcast %109 : vector<4x1xf32> to vector<4x256xf32>
    %111 = arith.mulf %110, %59 : vector<4x256xf32>
    %112 = arith.addf %108, %111 : vector<4x256xf32>
    %113 = vector.extract_strided_slice %93 {offsets = [0, 5], sizes = [4, 1], strides = [1, 1]} : vector<4x9xf32> to vector<4x1xf32>
    %114 = vector.broadcast %113 : vector<4x1xf32> to vector<4x256xf32>
    %115 = arith.mulf %114, %79 : vector<4x256xf32>
    %116 = arith.addf %112, %115 : vector<4x256xf32>
    %117 = vector.extract_strided_slice %93 {offsets = [0, 6], sizes = [4, 1], strides = [1, 1]} : vector<4x9xf32> to vector<4x1xf32>
    %118 = vector.broadcast %117 : vector<4x1xf32> to vector<4x256xf32>
    %119 = arith.mulf %118, %83 : vector<4x256xf32>
    %120 = arith.addf %116, %119 : vector<4x256xf32>
    %121 = vector.extract_strided_slice %93 {offsets = [0, 7], sizes = [4, 1], strides = [1, 1]} : vector<4x9xf32> to vector<4x1xf32>
    %122 = vector.broadcast %121 : vector<4x1xf32> to vector<4x256xf32>
    %123 = arith.mulf %122, %87 : vector<4x256xf32>
    %124 = arith.addf %120, %123 : vector<4x256xf32>
    %125 = vector.extract_strided_slice %93 {offsets = [0, 8], sizes = [4, 1], strides = [1, 1]} : vector<4x9xf32> to vector<4x1xf32>
    %126 = vector.broadcast %125 : vector<4x1xf32> to vector<4x256xf32>
    %127 = arith.mulf %126, %91 : vector<4x256xf32>
    %128 = arith.addf %124, %127 : vector<4x256xf32>
    %c0_11 = arith.constant 0 : index
    %c0_12 = arith.constant 0 : index
    %c0_13 = arith.constant 0 : index
    %129 = vector.load %arg6[%c0_11, %c0_12, %c0_13] : memref<2x4x1xf32, #tpu.memory_space<vmem>>, vector<1x4x1xf32>
    %130 = vector.shape_cast %129 : vector<1x4x1xf32> to vector<4x1xf32>
    %131 = vector.broadcast %130 : vector<4x1xf32> to vector<4x256xf32>
    %132 = arith.addf %128, %131 : vector<4x256xf32>
    %133 = arith.negf %132 : vector<4x256xf32>
    %134 = math.exp %133 : vector<4x256xf32>
    %cst_14 = arith.constant 1.000000e+00 : f32
    %135 = vector.broadcast %cst_14 : f32 to vector<4x256xf32>
    %136 = arith.addf %135, %134 : vector<4x256xf32>
    %137 = arith.divf %135, %136 : vector<4x256xf32>
    %138 = arith.mulf %132, %137 : vector<4x256xf32>
    %c0_15 = arith.constant 0 : index
    %c0_16 = arith.constant 0 : index
    %c0_17 = arith.constant 0 : index
    %139 = vector.load %arg7[%c0_15, %c0_16, %c0_17] : memref<2x4x4xf32, #tpu.memory_space<vmem>>, vector<1x4x4xf32>
    %140 = vector.shape_cast %139 : vector<1x4x4xf32> to vector<4x4xf32>
    %141 = vector.extract_strided_slice %140 {offsets = [0, 0], sizes = [4, 1], strides = [1, 1]} : vector<4x4xf32> to vector<4x1xf32>
    %142 = vector.extract_strided_slice %138 {offsets = [0, 0], sizes = [1, 256], strides = [1, 1]} : vector<4x256xf32> to vector<1x256xf32>
    %143 = vector.broadcast %141 : vector<4x1xf32> to vector<4x256xf32>
    %144 = vector.broadcast %142 : vector<1x256xf32> to vector<4x256xf32>
    %145 = arith.mulf %143, %144 : vector<4x256xf32>
    %146 = vector.extract_strided_slice %140 {offsets = [0, 1], sizes = [4, 1], strides = [1, 1]} : vector<4x4xf32> to vector<4x1xf32>
    %147 = vector.extract_strided_slice %138 {offsets = [1, 0], sizes = [1, 256], strides = [1, 1]} : vector<4x256xf32> to vector<1x256xf32>
    %148 = vector.broadcast %146 : vector<4x1xf32> to vector<4x256xf32>
    %149 = vector.broadcast %147 : vector<1x256xf32> to vector<4x256xf32>
    %150 = arith.mulf %148, %149 : vector<4x256xf32>
    %151 = arith.addf %145, %150 : vector<4x256xf32>
    %152 = vector.extract_strided_slice %140 {offsets = [0, 2], sizes = [4, 1], strides = [1, 1]} : vector<4x4xf32> to vector<4x1xf32>
    %153 = vector.extract_strided_slice %138 {offsets = [2, 0], sizes = [1, 256], strides = [1, 1]} : vector<4x256xf32> to vector<1x256xf32>
    %154 = vector.broadcast %152 : vector<4x1xf32> to vector<4x256xf32>
    %155 = vector.broadcast %153 : vector<1x256xf32> to vector<4x256xf32>
    %156 = arith.mulf %154, %155 : vector<4x256xf32>
    %157 = arith.addf %151, %156 : vector<4x256xf32>
    %158 = vector.extract_strided_slice %140 {offsets = [0, 3], sizes = [4, 1], strides = [1, 1]} : vector<4x4xf32> to vector<4x1xf32>
    %159 = vector.extract_strided_slice %138 {offsets = [3, 0], sizes = [1, 256], strides = [1, 1]} : vector<4x256xf32> to vector<1x256xf32>
    %160 = vector.broadcast %158 : vector<4x1xf32> to vector<4x256xf32>
    %161 = vector.broadcast %159 : vector<1x256xf32> to vector<4x256xf32>
    %162 = arith.mulf %160, %161 : vector<4x256xf32>
    %163 = arith.addf %157, %162 : vector<4x256xf32>
    %c1 = arith.constant 1 : index
    %c0_18 = arith.constant 0 : index
    %c0_19 = arith.constant 0 : index
    %164 = vector.load %arg5[%c1, %c0_18, %c0_19] : memref<2x4x9xf32, #tpu.memory_space<vmem>>, vector<1x4x9xf32>
    %165 = vector.shape_cast %164 : vector<1x4x9xf32> to vector<4x9xf32>
    %166 = vector.extract_strided_slice %165 {offsets = [0, 0], sizes = [4, 1], strides = [1, 1]} : vector<4x9xf32> to vector<4x1xf32>
    %167 = vector.broadcast %166 : vector<4x1xf32> to vector<4x256xf32>
    %168 = arith.mulf %167, %63 : vector<4x256xf32>
    %169 = vector.extract_strided_slice %165 {offsets = [0, 1], sizes = [4, 1], strides = [1, 1]} : vector<4x9xf32> to vector<4x1xf32>
    %170 = vector.broadcast %169 : vector<4x1xf32> to vector<4x256xf32>
    %171 = arith.mulf %170, %67 : vector<4x256xf32>
    %172 = arith.addf %168, %171 : vector<4x256xf32>
    %173 = vector.extract_strided_slice %165 {offsets = [0, 2], sizes = [4, 1], strides = [1, 1]} : vector<4x9xf32> to vector<4x1xf32>
    %174 = vector.broadcast %173 : vector<4x1xf32> to vector<4x256xf32>
    %175 = arith.mulf %174, %71 : vector<4x256xf32>
    %176 = arith.addf %172, %175 : vector<4x256xf32>
    %177 = vector.extract_strided_slice %165 {offsets = [0, 3], sizes = [4, 1], strides = [1, 1]} : vector<4x9xf32> to vector<4x1xf32>
    %178 = vector.broadcast %177 : vector<4x1xf32> to vector<4x256xf32>
    %179 = arith.mulf %178, %75 : vector<4x256xf32>
    %180 = arith.addf %176, %179 : vector<4x256xf32>
    %181 = vector.extract_strided_slice %165 {offsets = [0, 4], sizes = [4, 1], strides = [1, 1]} : vector<4x9xf32> to vector<4x1xf32>
    %182 = vector.broadcast %181 : vector<4x1xf32> to vector<4x256xf32>
    %183 = arith.mulf %182, %59 : vector<4x256xf32>
    %184 = arith.addf %180, %183 : vector<4x256xf32>
    %185 = vector.extract_strided_slice %165 {offsets = [0, 5], sizes = [4, 1], strides = [1, 1]} : vector<4x9xf32> to vector<4x1xf32>
    %186 = vector.broadcast %185 : vector<4x1xf32> to vector<4x256xf32>
    %187 = arith.mulf %186, %79 : vector<4x256xf32>
    %188 = arith.addf %184, %187 : vector<4x256xf32>
    %189 = vector.extract_strided_slice %165 {offsets = [0, 6], sizes = [4, 1], strides = [1, 1]} : vector<4x9xf32> to vector<4x1xf32>
    %190 = vector.broadcast %189 : vector<4x1xf32> to vector<4x256xf32>
    %191 = arith.mulf %190, %83 : vector<4x256xf32>
    %192 = arith.addf %188, %191 : vector<4x256xf32>
    %193 = vector.extract_strided_slice %165 {offsets = [0, 7], sizes = [4, 1], strides = [1, 1]} : vector<4x9xf32> to vector<4x1xf32>
    %194 = vector.broadcast %193 : vector<4x1xf32> to vector<4x256xf32>
    %195 = arith.mulf %194, %87 : vector<4x256xf32>
    %196 = arith.addf %192, %195 : vector<4x256xf32>
    %197 = vector.extract_strided_slice %165 {offsets = [0, 8], sizes = [4, 1], strides = [1, 1]} : vector<4x9xf32> to vector<4x1xf32>
    %198 = vector.broadcast %197 : vector<4x1xf32> to vector<4x256xf32>
    %199 = arith.mulf %198, %91 : vector<4x256xf32>
    %200 = arith.addf %196, %199 : vector<4x256xf32>
    %c1_20 = arith.constant 1 : index
    %c0_21 = arith.constant 0 : index
    %c0_22 = arith.constant 0 : index
    %201 = vector.load %arg6[%c1_20, %c0_21, %c0_22] : memref<2x4x1xf32, #tpu.memory_space<vmem>>, vector<1x4x1xf32>
    %202 = vector.shape_cast %201 : vector<1x4x1xf32> to vector<4x1xf32>
    %203 = vector.broadcast %202 : vector<4x1xf32> to vector<4x256xf32>
    %204 = arith.addf %200, %203 : vector<4x256xf32>
    %205 = arith.negf %204 : vector<4x256xf32>
    %206 = math.exp %205 : vector<4x256xf32>
    %cst_23 = arith.constant 1.000000e+00 : f32
    %207 = vector.broadcast %cst_23 : f32 to vector<4x256xf32>
    %208 = arith.addf %207, %206 : vector<4x256xf32>
    %209 = arith.divf %207, %208 : vector<4x256xf32>
    %210 = arith.mulf %204, %209 : vector<4x256xf32>
    %c1_24 = arith.constant 1 : index
    %c0_25 = arith.constant 0 : index
    %c0_26 = arith.constant 0 : index
    %211 = vector.load %arg7[%c1_24, %c0_25, %c0_26] : memref<2x4x4xf32, #tpu.memory_space<vmem>>, vector<1x4x4xf32>
    %212 = vector.shape_cast %211 : vector<1x4x4xf32> to vector<4x4xf32>
    %213 = vector.extract_strided_slice %212 {offsets = [0, 0], sizes = [4, 1], strides = [1, 1]} : vector<4x4xf32> to vector<4x1xf32>
    %214 = vector.extract_strided_slice %210 {offsets = [0, 0], sizes = [1, 256], strides = [1, 1]} : vector<4x256xf32> to vector<1x256xf32>
    %215 = vector.broadcast %213 : vector<4x1xf32> to vector<4x256xf32>
    %216 = vector.broadcast %214 : vector<1x256xf32> to vector<4x256xf32>
    %217 = arith.mulf %215, %216 : vector<4x256xf32>
    %218 = vector.extract_strided_slice %212 {offsets = [0, 1], sizes = [4, 1], strides = [1, 1]} : vector<4x4xf32> to vector<4x1xf32>
    %219 = vector.extract_strided_slice %210 {offsets = [1, 0], sizes = [1, 256], strides = [1, 1]} : vector<4x256xf32> to vector<1x256xf32>
    %220 = vector.broadcast %218 : vector<4x1xf32> to vector<4x256xf32>
    %221 = vector.broadcast %219 : vector<1x256xf32> to vector<4x256xf32>
    %222 = arith.mulf %220, %221 : vector<4x256xf32>
    %223 = arith.addf %217, %222 : vector<4x256xf32>
    %224 = vector.extract_strided_slice %212 {offsets = [0, 2], sizes = [4, 1], strides = [1, 1]} : vector<4x4xf32> to vector<4x1xf32>
    %225 = vector.extract_strided_slice %210 {offsets = [2, 0], sizes = [1, 256], strides = [1, 1]} : vector<4x256xf32> to vector<1x256xf32>
    %226 = vector.broadcast %224 : vector<4x1xf32> to vector<4x256xf32>
    %227 = vector.broadcast %225 : vector<1x256xf32> to vector<4x256xf32>
    %228 = arith.mulf %226, %227 : vector<4x256xf32>
    %229 = arith.addf %223, %228 : vector<4x256xf32>
    %230 = vector.extract_strided_slice %212 {offsets = [0, 3], sizes = [4, 1], strides = [1, 1]} : vector<4x4xf32> to vector<4x1xf32>
    %231 = vector.extract_strided_slice %210 {offsets = [3, 0], sizes = [1, 256], strides = [1, 1]} : vector<4x256xf32> to vector<1x256xf32>
    %232 = vector.broadcast %230 : vector<4x1xf32> to vector<4x256xf32>
    %233 = vector.broadcast %231 : vector<1x256xf32> to vector<4x256xf32>
    %234 = arith.mulf %232, %233 : vector<4x256xf32>
    %235 = arith.addf %229, %234 : vector<4x256xf32>
    %236 = arith.addf %163, %235 : vector<4x256xf32>
    %c0_27 = arith.constant 0 : index
    %c0_28 = arith.constant 0 : index
    %237 = vector.load %arg8[%c0_27, %c0_28] : memref<4x1xf32, #tpu.memory_space<vmem>>, vector<4x1xf32>
    %238 = vector.broadcast %237 : vector<4x1xf32> to vector<4x256xf32>
    %239 = arith.addf %236, %238 : vector<4x256xf32>
    %240 = arith.negf %239 : vector<4x256xf32>
    %241 = math.exp %240 : vector<4x256xf32>
    %cst_29 = arith.constant 1.000000e+00 : f32
    %242 = vector.broadcast %cst_29 : f32 to vector<4x256xf32>
    %243 = arith.addf %242, %241 : vector<4x256xf32>
    %244 = arith.divf %242, %243 : vector<4x256xf32>
    %245 = arith.mulf %239, %244 : vector<4x256xf32>
    %c17_i32_30 = arith.constant 17 : i32
    %246 = tpu.dynamic_rotate %245 by %c17_i32_30 dim 1 : vector<4x256xf32>, i32 -> vector<4x256xf32>
    %247 = vector.extract_strided_slice %2 {offsets = [0, 0], sizes = [1, 256], strides = [1, 1]} : vector<8x256xf32> to vector<1x256xf32>
    %248 = vector.broadcast %247 : vector<1x256xf32> to vector<4x256xf32>
    %249 = arith.mulf %246, %248 : vector<4x256xf32>
    %c16_i32_31 = arith.constant 16 : i32
    %250 = tpu.dynamic_rotate %245 by %c16_i32_31 dim 1 : vector<4x256xf32>, i32 -> vector<4x256xf32>
    %251 = vector.extract_strided_slice %2 {offsets = [1, 0], sizes = [1, 256], strides = [1, 1]} : vector<8x256xf32> to vector<1x256xf32>
    %252 = vector.broadcast %251 : vector<1x256xf32> to vector<4x256xf32>
    %253 = arith.mulf %250, %252 : vector<4x256xf32>
    %c15_i32_32 = arith.constant 15 : i32
    %254 = tpu.dynamic_rotate %245 by %c15_i32_32 dim 1 : vector<4x256xf32>, i32 -> vector<4x256xf32>
    %255 = vector.extract_strided_slice %2 {offsets = [2, 0], sizes = [1, 256], strides = [1, 1]} : vector<8x256xf32> to vector<1x256xf32>
    %256 = vector.broadcast %255 : vector<1x256xf32> to vector<4x256xf32>
    %257 = arith.mulf %254, %256 : vector<4x256xf32>
    %c1_i32_33 = arith.constant 1 : i32
    %258 = tpu.dynamic_rotate %245 by %c1_i32_33 dim 1 : vector<4x256xf32>, i32 -> vector<4x256xf32>
    %259 = vector.extract_strided_slice %2 {offsets = [3, 0], sizes = [1, 256], strides = [1, 1]} : vector<8x256xf32> to vector<1x256xf32>
    %260 = vector.broadcast %259 : vector<1x256xf32> to vector<4x256xf32>
    %261 = arith.mulf %258, %260 : vector<4x256xf32>
    %c255_i32_34 = arith.constant 255 : i32
    %262 = tpu.dynamic_rotate %245 by %c255_i32_34 dim 1 : vector<4x256xf32>, i32 -> vector<4x256xf32>
    %263 = vector.extract_strided_slice %2 {offsets = [4, 0], sizes = [1, 256], strides = [1, 1]} : vector<8x256xf32> to vector<1x256xf32>
    %264 = vector.broadcast %263 : vector<1x256xf32> to vector<4x256xf32>
    %265 = arith.mulf %262, %264 : vector<4x256xf32>
    %c241_i32_35 = arith.constant 241 : i32
    %266 = tpu.dynamic_rotate %245 by %c241_i32_35 dim 1 : vector<4x256xf32>, i32 -> vector<4x256xf32>
    %267 = vector.extract_strided_slice %2 {offsets = [5, 0], sizes = [1, 256], strides = [1, 1]} : vector<8x256xf32> to vector<1x256xf32>
    %268 = vector.broadcast %267 : vector<1x256xf32> to vector<4x256xf32>
    %269 = arith.mulf %266, %268 : vector<4x256xf32>
    %c240_i32_36 = arith.constant 240 : i32
    %270 = tpu.dynamic_rotate %245 by %c240_i32_36 dim 1 : vector<4x256xf32>, i32 -> vector<4x256xf32>
    %271 = vector.extract_strided_slice %2 {offsets = [6, 0], sizes = [1, 256], strides = [1, 1]} : vector<8x256xf32> to vector<1x256xf32>
    %272 = vector.broadcast %271 : vector<1x256xf32> to vector<4x256xf32>
    %273 = arith.mulf %270, %272 : vector<4x256xf32>
    %c239_i32_37 = arith.constant 239 : i32
    %274 = tpu.dynamic_rotate %245 by %c239_i32_37 dim 1 : vector<4x256xf32>, i32 -> vector<4x256xf32>
    %275 = vector.extract_strided_slice %2 {offsets = [7, 0], sizes = [1, 256], strides = [1, 1]} : vector<8x256xf32> to vector<1x256xf32>
    %276 = vector.broadcast %275 : vector<1x256xf32> to vector<4x256xf32>
    %277 = arith.mulf %274, %276 : vector<4x256xf32>
    %c0_38 = arith.constant 0 : index
    %c0_39 = arith.constant 0 : index
    %c0_40 = arith.constant 0 : index
    %278 = vector.load %arg9[%c0_38, %c0_39, %c0_40] : memref<2x4x9xf32, #tpu.memory_space<vmem>>, vector<1x4x9xf32>
    %279 = vector.shape_cast %278 : vector<1x4x9xf32> to vector<4x9xf32>
    %280 = vector.extract_strided_slice %279 {offsets = [0, 0], sizes = [4, 1], strides = [1, 1]} : vector<4x9xf32> to vector<4x1xf32>
    %281 = vector.broadcast %280 : vector<4x1xf32> to vector<4x256xf32>
    %282 = arith.mulf %281, %249 : vector<4x256xf32>
    %283 = vector.extract_strided_slice %279 {offsets = [0, 1], sizes = [4, 1], strides = [1, 1]} : vector<4x9xf32> to vector<4x1xf32>
    %284 = vector.broadcast %283 : vector<4x1xf32> to vector<4x256xf32>
    %285 = arith.mulf %284, %253 : vector<4x256xf32>
    %286 = arith.addf %282, %285 : vector<4x256xf32>
    %287 = vector.extract_strided_slice %279 {offsets = [0, 2], sizes = [4, 1], strides = [1, 1]} : vector<4x9xf32> to vector<4x1xf32>
    %288 = vector.broadcast %287 : vector<4x1xf32> to vector<4x256xf32>
    %289 = arith.mulf %288, %257 : vector<4x256xf32>
    %290 = arith.addf %286, %289 : vector<4x256xf32>
    %291 = vector.extract_strided_slice %279 {offsets = [0, 3], sizes = [4, 1], strides = [1, 1]} : vector<4x9xf32> to vector<4x1xf32>
    %292 = vector.broadcast %291 : vector<4x1xf32> to vector<4x256xf32>
    %293 = arith.mulf %292, %261 : vector<4x256xf32>
    %294 = arith.addf %290, %293 : vector<4x256xf32>
    %295 = vector.extract_strided_slice %279 {offsets = [0, 4], sizes = [4, 1], strides = [1, 1]} : vector<4x9xf32> to vector<4x1xf32>
    %296 = vector.broadcast %295 : vector<4x1xf32> to vector<4x256xf32>
    %297 = arith.mulf %296, %245 : vector<4x256xf32>
    %298 = arith.addf %294, %297 : vector<4x256xf32>
    %299 = vector.extract_strided_slice %279 {offsets = [0, 5], sizes = [4, 1], strides = [1, 1]} : vector<4x9xf32> to vector<4x1xf32>
    %300 = vector.broadcast %299 : vector<4x1xf32> to vector<4x256xf32>
    %301 = arith.mulf %300, %265 : vector<4x256xf32>
    %302 = arith.addf %298, %301 : vector<4x256xf32>
    %303 = vector.extract_strided_slice %279 {offsets = [0, 6], sizes = [4, 1], strides = [1, 1]} : vector<4x9xf32> to vector<4x1xf32>
    %304 = vector.broadcast %303 : vector<4x1xf32> to vector<4x256xf32>
    %305 = arith.mulf %304, %269 : vector<4x256xf32>
    %306 = arith.addf %302, %305 : vector<4x256xf32>
    %307 = vector.extract_strided_slice %279 {offsets = [0, 7], sizes = [4, 1], strides = [1, 1]} : vector<4x9xf32> to vector<4x1xf32>
    %308 = vector.broadcast %307 : vector<4x1xf32> to vector<4x256xf32>
    %309 = arith.mulf %308, %273 : vector<4x256xf32>
    %310 = arith.addf %306, %309 : vector<4x256xf32>
    %311 = vector.extract_strided_slice %279 {offsets = [0, 8], sizes = [4, 1], strides = [1, 1]} : vector<4x9xf32> to vector<4x1xf32>
    %312 = vector.broadcast %311 : vector<4x1xf32> to vector<4x256xf32>
    %313 = arith.mulf %312, %277 : vector<4x256xf32>
    %314 = arith.addf %310, %313 : vector<4x256xf32>
    %c0_41 = arith.constant 0 : index
    %c0_42 = arith.constant 0 : index
    %c0_43 = arith.constant 0 : index
    %315 = vector.load %arg10[%c0_41, %c0_42, %c0_43] : memref<2x4x1xf32, #tpu.memory_space<vmem>>, vector<1x4x1xf32>
    %316 = vector.shape_cast %315 : vector<1x4x1xf32> to vector<4x1xf32>
    %317 = vector.broadcast %316 : vector<4x1xf32> to vector<4x256xf32>
    %318 = arith.addf %314, %317 : vector<4x256xf32>
    %319 = arith.negf %318 : vector<4x256xf32>
    %320 = math.exp %319 : vector<4x256xf32>
    %cst_44 = arith.constant 1.000000e+00 : f32
    %321 = vector.broadcast %cst_44 : f32 to vector<4x256xf32>
    %322 = arith.addf %321, %320 : vector<4x256xf32>
    %323 = arith.divf %321, %322 : vector<4x256xf32>
    %324 = arith.mulf %318, %323 : vector<4x256xf32>
    %c0_45 = arith.constant 0 : index
    %c0_46 = arith.constant 0 : index
    %c0_47 = arith.constant 0 : index
    %325 = vector.load %arg11[%c0_45, %c0_46, %c0_47] : memref<2x4x4xf32, #tpu.memory_space<vmem>>, vector<1x4x4xf32>
    %326 = vector.shape_cast %325 : vector<1x4x4xf32> to vector<4x4xf32>
    %327 = vector.extract_strided_slice %326 {offsets = [0, 0], sizes = [4, 1], strides = [1, 1]} : vector<4x4xf32> to vector<4x1xf32>
    %328 = vector.extract_strided_slice %324 {offsets = [0, 0], sizes = [1, 256], strides = [1, 1]} : vector<4x256xf32> to vector<1x256xf32>
    %329 = vector.broadcast %327 : vector<4x1xf32> to vector<4x256xf32>
    %330 = vector.broadcast %328 : vector<1x256xf32> to vector<4x256xf32>
    %331 = arith.mulf %329, %330 : vector<4x256xf32>
    %332 = vector.extract_strided_slice %326 {offsets = [0, 1], sizes = [4, 1], strides = [1, 1]} : vector<4x4xf32> to vector<4x1xf32>
    %333 = vector.extract_strided_slice %324 {offsets = [1, 0], sizes = [1, 256], strides = [1, 1]} : vector<4x256xf32> to vector<1x256xf32>
    %334 = vector.broadcast %332 : vector<4x1xf32> to vector<4x256xf32>
    %335 = vector.broadcast %333 : vector<1x256xf32> to vector<4x256xf32>
    %336 = arith.mulf %334, %335 : vector<4x256xf32>
    %337 = arith.addf %331, %336 : vector<4x256xf32>
    %338 = vector.extract_strided_slice %326 {offsets = [0, 2], sizes = [4, 1], strides = [1, 1]} : vector<4x4xf32> to vector<4x1xf32>
    %339 = vector.extract_strided_slice %324 {offsets = [2, 0], sizes = [1, 256], strides = [1, 1]} : vector<4x256xf32> to vector<1x256xf32>
    %340 = vector.broadcast %338 : vector<4x1xf32> to vector<4x256xf32>
    %341 = vector.broadcast %339 : vector<1x256xf32> to vector<4x256xf32>
    %342 = arith.mulf %340, %341 : vector<4x256xf32>
    %343 = arith.addf %337, %342 : vector<4x256xf32>
    %344 = vector.extract_strided_slice %326 {offsets = [0, 3], sizes = [4, 1], strides = [1, 1]} : vector<4x4xf32> to vector<4x1xf32>
    %345 = vector.extract_strided_slice %324 {offsets = [3, 0], sizes = [1, 256], strides = [1, 1]} : vector<4x256xf32> to vector<1x256xf32>
    %346 = vector.broadcast %344 : vector<4x1xf32> to vector<4x256xf32>
    %347 = vector.broadcast %345 : vector<1x256xf32> to vector<4x256xf32>
    %348 = arith.mulf %346, %347 : vector<4x256xf32>
    %349 = arith.addf %343, %348 : vector<4x256xf32>
    %c1_48 = arith.constant 1 : index
    %c0_49 = arith.constant 0 : index
    %c0_50 = arith.constant 0 : index
    %350 = vector.load %arg9[%c1_48, %c0_49, %c0_50] : memref<2x4x9xf32, #tpu.memory_space<vmem>>, vector<1x4x9xf32>
    %351 = vector.shape_cast %350 : vector<1x4x9xf32> to vector<4x9xf32>
    %352 = vector.extract_strided_slice %351 {offsets = [0, 0], sizes = [4, 1], strides = [1, 1]} : vector<4x9xf32> to vector<4x1xf32>
    %353 = vector.broadcast %352 : vector<4x1xf32> to vector<4x256xf32>
    %354 = arith.mulf %353, %249 : vector<4x256xf32>
    %355 = vector.extract_strided_slice %351 {offsets = [0, 1], sizes = [4, 1], strides = [1, 1]} : vector<4x9xf32> to vector<4x1xf32>
    %356 = vector.broadcast %355 : vector<4x1xf32> to vector<4x256xf32>
    %357 = arith.mulf %356, %253 : vector<4x256xf32>
    %358 = arith.addf %354, %357 : vector<4x256xf32>
    %359 = vector.extract_strided_slice %351 {offsets = [0, 2], sizes = [4, 1], strides = [1, 1]} : vector<4x9xf32> to vector<4x1xf32>
    %360 = vector.broadcast %359 : vector<4x1xf32> to vector<4x256xf32>
    %361 = arith.mulf %360, %257 : vector<4x256xf32>
    %362 = arith.addf %358, %361 : vector<4x256xf32>
    %363 = vector.extract_strided_slice %351 {offsets = [0, 3], sizes = [4, 1], strides = [1, 1]} : vector<4x9xf32> to vector<4x1xf32>
    %364 = vector.broadcast %363 : vector<4x1xf32> to vector<4x256xf32>
    %365 = arith.mulf %364, %261 : vector<4x256xf32>
    %366 = arith.addf %362, %365 : vector<4x256xf32>
    %367 = vector.extract_strided_slice %351 {offsets = [0, 4], sizes = [4, 1], strides = [1, 1]} : vector<4x9xf32> to vector<4x1xf32>
    %368 = vector.broadcast %367 : vector<4x1xf32> to vector<4x256xf32>
    %369 = arith.mulf %368, %245 : vector<4x256xf32>
    %370 = arith.addf %366, %369 : vector<4x256xf32>
    %371 = vector.extract_strided_slice %351 {offsets = [0, 5], sizes = [4, 1], strides = [1, 1]} : vector<4x9xf32> to vector<4x1xf32>
    %372 = vector.broadcast %371 : vector<4x1xf32> to vector<4x256xf32>
    %373 = arith.mulf %372, %265 : vector<4x256xf32>
    %374 = arith.addf %370, %373 : vector<4x256xf32>
    %375 = vector.extract_strided_slice %351 {offsets = [0, 6], sizes = [4, 1], strides = [1, 1]} : vector<4x9xf32> to vector<4x1xf32>
    %376 = vector.broadcast %375 : vector<4x1xf32> to vector<4x256xf32>
    %377 = arith.mulf %376, %269 : vector<4x256xf32>
    %378 = arith.addf %374, %377 : vector<4x256xf32>
    %379 = vector.extract_strided_slice %351 {offsets = [0, 7], sizes = [4, 1], strides = [1, 1]} : vector<4x9xf32> to vector<4x1xf32>
    %380 = vector.broadcast %379 : vector<4x1xf32> to vector<4x256xf32>
    %381 = arith.mulf %380, %273 : vector<4x256xf32>
    %382 = arith.addf %378, %381 : vector<4x256xf32>
    %383 = vector.extract_strided_slice %351 {offsets = [0, 8], sizes = [4, 1], strides = [1, 1]} : vector<4x9xf32> to vector<4x1xf32>
    %384 = vector.broadcast %383 : vector<4x1xf32> to vector<4x256xf32>
    %385 = arith.mulf %384, %277 : vector<4x256xf32>
    %386 = arith.addf %382, %385 : vector<4x256xf32>
    %c1_51 = arith.constant 1 : index
    %c0_52 = arith.constant 0 : index
    %c0_53 = arith.constant 0 : index
    %387 = vector.load %arg10[%c1_51, %c0_52, %c0_53] : memref<2x4x1xf32, #tpu.memory_space<vmem>>, vector<1x4x1xf32>
    %388 = vector.shape_cast %387 : vector<1x4x1xf32> to vector<4x1xf32>
    %389 = vector.broadcast %388 : vector<4x1xf32> to vector<4x256xf32>
    %390 = arith.addf %386, %389 : vector<4x256xf32>
    %391 = arith.negf %390 : vector<4x256xf32>
    %392 = math.exp %391 : vector<4x256xf32>
    %cst_54 = arith.constant 1.000000e+00 : f32
    %393 = vector.broadcast %cst_54 : f32 to vector<4x256xf32>
    %394 = arith.addf %393, %392 : vector<4x256xf32>
    %395 = arith.divf %393, %394 : vector<4x256xf32>
    %396 = arith.mulf %390, %395 : vector<4x256xf32>
    %c1_55 = arith.constant 1 : index
    %c0_56 = arith.constant 0 : index
    %c0_57 = arith.constant 0 : index
    %397 = vector.load %arg11[%c1_55, %c0_56, %c0_57] : memref<2x4x4xf32, #tpu.memory_space<vmem>>, vector<1x4x4xf32>
    %398 = vector.shape_cast %397 : vector<1x4x4xf32> to vector<4x4xf32>
    %399 = vector.extract_strided_slice %398 {offsets = [0, 0], sizes = [4, 1], strides = [1, 1]} : vector<4x4xf32> to vector<4x1xf32>
    %400 = vector.extract_strided_slice %396 {offsets = [0, 0], sizes = [1, 256], strides = [1, 1]} : vector<4x256xf32> to vector<1x256xf32>
    %401 = vector.broadcast %399 : vector<4x1xf32> to vector<4x256xf32>
    %402 = vector.broadcast %400 : vector<1x256xf32> to vector<4x256xf32>
    %403 = arith.mulf %401, %402 : vector<4x256xf32>
    %404 = vector.extract_strided_slice %398 {offsets = [0, 1], sizes = [4, 1], strides = [1, 1]} : vector<4x4xf32> to vector<4x1xf32>
    %405 = vector.extract_strided_slice %396 {offsets = [1, 0], sizes = [1, 256], strides = [1, 1]} : vector<4x256xf32> to vector<1x256xf32>
    %406 = vector.broadcast %404 : vector<4x1xf32> to vector<4x256xf32>
    %407 = vector.broadcast %405 : vector<1x256xf32> to vector<4x256xf32>
    %408 = arith.mulf %406, %407 : vector<4x256xf32>
    %409 = arith.addf %403, %408 : vector<4x256xf32>
    %410 = vector.extract_strided_slice %398 {offsets = [0, 2], sizes = [4, 1], strides = [1, 1]} : vector<4x4xf32> to vector<4x1xf32>
    %411 = vector.extract_strided_slice %396 {offsets = [2, 0], sizes = [1, 256], strides = [1, 1]} : vector<4x256xf32> to vector<1x256xf32>
    %412 = vector.broadcast %410 : vector<4x1xf32> to vector<4x256xf32>
    %413 = vector.broadcast %411 : vector<1x256xf32> to vector<4x256xf32>
    %414 = arith.mulf %412, %413 : vector<4x256xf32>
    %415 = arith.addf %409, %414 : vector<4x256xf32>
    %416 = vector.extract_strided_slice %398 {offsets = [0, 3], sizes = [4, 1], strides = [1, 1]} : vector<4x4xf32> to vector<4x1xf32>
    %417 = vector.extract_strided_slice %396 {offsets = [3, 0], sizes = [1, 256], strides = [1, 1]} : vector<4x256xf32> to vector<1x256xf32>
    %418 = vector.broadcast %416 : vector<4x1xf32> to vector<4x256xf32>
    %419 = vector.broadcast %417 : vector<1x256xf32> to vector<4x256xf32>
    %420 = arith.mulf %418, %419 : vector<4x256xf32>
    %421 = arith.addf %415, %420 : vector<4x256xf32>
    %422 = arith.addf %349, %421 : vector<4x256xf32>
    %c0_58 = arith.constant 0 : index
    %c0_59 = arith.constant 0 : index
    %423 = vector.load %arg12[%c0_58, %c0_59] : memref<4x1xf32, #tpu.memory_space<vmem>>, vector<4x1xf32>
    %424 = vector.broadcast %423 : vector<4x1xf32> to vector<4x256xf32>
    %425 = arith.addf %422, %424 : vector<4x256xf32>
    %426 = arith.negf %425 : vector<4x256xf32>
    %427 = math.exp %426 : vector<4x256xf32>
    %cst_60 = arith.constant 1.000000e+00 : f32
    %428 = vector.broadcast %cst_60 : f32 to vector<4x256xf32>
    %429 = arith.addf %428, %427 : vector<4x256xf32>
    %430 = arith.divf %428, %429 : vector<4x256xf32>
    %431 = arith.mulf %425, %430 : vector<4x256xf32>
    %432 = vector.extract_strided_slice %3 {offsets = [0, 0], sizes = [4, 4], strides = [1, 1]} : vector<4x8xf32> to vector<4x4xf32>
    %433 = vector.extract_strided_slice %432 {offsets = [0, 0], sizes = [4, 1], strides = [1, 1]} : vector<4x4xf32> to vector<4x1xf32>
    %434 = vector.extract_strided_slice %59 {offsets = [0, 0], sizes = [1, 256], strides = [1, 1]} : vector<4x256xf32> to vector<1x256xf32>
    %435 = vector.broadcast %433 : vector<4x1xf32> to vector<4x256xf32>
    %436 = vector.broadcast %434 : vector<1x256xf32> to vector<4x256xf32>
    %437 = arith.mulf %435, %436 : vector<4x256xf32>
    %438 = vector.extract_strided_slice %432 {offsets = [0, 1], sizes = [4, 1], strides = [1, 1]} : vector<4x4xf32> to vector<4x1xf32>
    %439 = vector.extract_strided_slice %59 {offsets = [1, 0], sizes = [1, 256], strides = [1, 1]} : vector<4x256xf32> to vector<1x256xf32>
    %440 = vector.broadcast %438 : vector<4x1xf32> to vector<4x256xf32>
    %441 = vector.broadcast %439 : vector<1x256xf32> to vector<4x256xf32>
    %442 = arith.mulf %440, %441 : vector<4x256xf32>
    %443 = arith.addf %437, %442 : vector<4x256xf32>
    %444 = vector.extract_strided_slice %432 {offsets = [0, 2], sizes = [4, 1], strides = [1, 1]} : vector<4x4xf32> to vector<4x1xf32>
    %445 = vector.extract_strided_slice %59 {offsets = [2, 0], sizes = [1, 256], strides = [1, 1]} : vector<4x256xf32> to vector<1x256xf32>
    %446 = vector.broadcast %444 : vector<4x1xf32> to vector<4x256xf32>
    %447 = vector.broadcast %445 : vector<1x256xf32> to vector<4x256xf32>
    %448 = arith.mulf %446, %447 : vector<4x256xf32>
    %449 = arith.addf %443, %448 : vector<4x256xf32>
    %450 = vector.extract_strided_slice %432 {offsets = [0, 3], sizes = [4, 1], strides = [1, 1]} : vector<4x4xf32> to vector<4x1xf32>
    %451 = vector.extract_strided_slice %59 {offsets = [3, 0], sizes = [1, 256], strides = [1, 1]} : vector<4x256xf32> to vector<1x256xf32>
    %452 = vector.broadcast %450 : vector<4x1xf32> to vector<4x256xf32>
    %453 = vector.broadcast %451 : vector<1x256xf32> to vector<4x256xf32>
    %454 = arith.mulf %452, %453 : vector<4x256xf32>
    %455 = arith.addf %449, %454 : vector<4x256xf32>
    %456 = vector.extract_strided_slice %3 {offsets = [0, 4], sizes = [4, 4], strides = [1, 1]} : vector<4x8xf32> to vector<4x4xf32>
    %457 = vector.extract_strided_slice %456 {offsets = [0, 0], sizes = [4, 1], strides = [1, 1]} : vector<4x4xf32> to vector<4x1xf32>
    %458 = vector.extract_strided_slice %431 {offsets = [0, 0], sizes = [1, 256], strides = [1, 1]} : vector<4x256xf32> to vector<1x256xf32>
    %459 = vector.broadcast %457 : vector<4x1xf32> to vector<4x256xf32>
    %460 = vector.broadcast %458 : vector<1x256xf32> to vector<4x256xf32>
    %461 = arith.mulf %459, %460 : vector<4x256xf32>
    %462 = vector.extract_strided_slice %456 {offsets = [0, 1], sizes = [4, 1], strides = [1, 1]} : vector<4x4xf32> to vector<4x1xf32>
    %463 = vector.extract_strided_slice %431 {offsets = [1, 0], sizes = [1, 256], strides = [1, 1]} : vector<4x256xf32> to vector<1x256xf32>
    %464 = vector.broadcast %462 : vector<4x1xf32> to vector<4x256xf32>
    %465 = vector.broadcast %463 : vector<1x256xf32> to vector<4x256xf32>
    %466 = arith.mulf %464, %465 : vector<4x256xf32>
    %467 = arith.addf %461, %466 : vector<4x256xf32>
    %468 = vector.extract_strided_slice %456 {offsets = [0, 2], sizes = [4, 1], strides = [1, 1]} : vector<4x4xf32> to vector<4x1xf32>
    %469 = vector.extract_strided_slice %431 {offsets = [2, 0], sizes = [1, 256], strides = [1, 1]} : vector<4x256xf32> to vector<1x256xf32>
    %470 = vector.broadcast %468 : vector<4x1xf32> to vector<4x256xf32>
    %471 = vector.broadcast %469 : vector<1x256xf32> to vector<4x256xf32>
    %472 = arith.mulf %470, %471 : vector<4x256xf32>
    %473 = arith.addf %467, %472 : vector<4x256xf32>
    %474 = vector.extract_strided_slice %456 {offsets = [0, 3], sizes = [4, 1], strides = [1, 1]} : vector<4x4xf32> to vector<4x1xf32>
    %475 = vector.extract_strided_slice %431 {offsets = [3, 0], sizes = [1, 256], strides = [1, 1]} : vector<4x256xf32> to vector<1x256xf32>
    %476 = vector.broadcast %474 : vector<4x1xf32> to vector<4x256xf32>
    %477 = vector.broadcast %475 : vector<1x256xf32> to vector<4x256xf32>
    %478 = arith.mulf %476, %477 : vector<4x256xf32>
    %479 = arith.addf %473, %478 : vector<4x256xf32>
    %480 = arith.addf %455, %479 : vector<4x256xf32>
    %481 = vector.broadcast %4 : vector<4x1xf32> to vector<4x256xf32>
    %482 = arith.addf %480, %481 : vector<4x256xf32>
    %483 = arith.negf %482 : vector<4x256xf32>
    %484 = math.exp %483 : vector<4x256xf32>
    %cst_61 = arith.constant 1.000000e+00 : f32
    %485 = vector.broadcast %cst_61 : f32 to vector<4x256xf32>
    %486 = arith.addf %485, %484 : vector<4x256xf32>
    %487 = arith.divf %485, %486 : vector<4x256xf32>
    %488 = arith.mulf %482, %487 : vector<4x256xf32>
    %c0_62 = arith.constant 0 : index
    %c0_63 = arith.constant 0 : index
    %c0_64 = arith.constant 0 : index
    %489 = vector.load %arg13[%c0_62, %c0_63, %c0_64] : memref<1x4x256xf32, #tpu.memory_space<vmem>>, vector<1x4x256xf32>
    %490 = vector.shape_cast %489 : vector<1x4x256xf32> to vector<4x256xf32>
    %491 = vector.shape_cast %488 : vector<4x256xf32> to vector<1x4x256xf32>
    tpu.vector_store %arg13[%c0_62, %c0_63, %c0_64], %491 {strides = array<i32>} : memref<1x4x256xf32, #tpu.memory_space<vmem>>, vector<1x4x256xf32>,
    return
  }
  func.func @transform_0(%arg0: i32) -> (i32, i32, i32) {
    %c0_i32 = arith.constant 0 : i32
    %c0_i32_0 = arith.constant 0 : i32
    %c0_i32_1 = arith.constant 0 : i32
    return %arg0, %c0_i32, %c0_i32_0 : i32, i32, i32
  }
  func.func @transform_1(%arg0: i32) -> (i32, i32) {
    %c0_i32 = arith.constant 0 : i32
    %c0_i32_0 = arith.constant 0 : i32
    %c0_i32_1 = arith.constant 0 : i32
    return %c0_i32, %c0_i32_0 : i32, i32
  }
  func.func @transform_2(%arg0: i32) -> (i32, i32) {
    %c0_i32 = arith.constant 0 : i32
    %c0_i32_0 = arith.constant 0 : i32
    %c0_i32_1 = arith.constant 0 : i32
    return %c0_i32, %c0_i32_0 : i32, i32
  }
  func.func @transform_3(%arg0: i32) -> (i32, i32) {
    %c0_i32 = arith.constant 0 : i32
    %c0_i32_0 = arith.constant 0 : i32
    %c0_i32_1 = arith.constant 0 : i32
    return %c0_i32, %c0_i32_0 : i32, i32
  }
  func.func @transform_4(%arg0: i32) -> (i32, i32, i32) {
    %c0_i32 = arith.constant 0 : i32
    %c0_i32_0 = arith.constant 0 : i32
    %c0_i32_1 = arith.constant 0 : i32
    %c0_i32_2 = arith.constant 0 : i32
    return %c0_i32, %c0_i32_0, %c0_i32_1 : i32, i32, i32
  }
  func.func @transform_5(%arg0: i32) -> (i32, i32, i32) {
    %c0_i32 = arith.constant 0 : i32
    %c0_i32_0 = arith.constant 0 : i32
    %c0_i32_1 = arith.constant 0 : i32
    %c0_i32_2 = arith.constant 0 : i32
    return %c0_i32, %c0_i32_0, %c0_i32_1 : i32, i32, i32
  }
  func.func @transform_6(%arg0: i32) -> (i32, i32, i32) {
    %c0_i32 = arith.constant 0 : i32
    %c0_i32_0 = arith.constant 0 : i32
    %c0_i32_1 = arith.constant 0 : i32
    %c0_i32_2 = arith.constant 0 : i32
    return %c0_i32, %c0_i32_0, %c0_i32_1 : i32, i32, i32
  }
  func.func @transform_7(%arg0: i32) -> (i32, i32) {
    %c0_i32 = arith.constant 0 : i32
    %c0_i32_0 = arith.constant 0 : i32
    %c0_i32_1 = arith.constant 0 : i32
    return %c0_i32, %c0_i32_0 : i32, i32
  }
  func.func @transform_8(%arg0: i32) -> (i32, i32, i32) {
    %c0_i32 = arith.constant 0 : i32
    %c0_i32_0 = arith.constant 0 : i32
    %c0_i32_1 = arith.constant 0 : i32
    %c0_i32_2 = arith.constant 0 : i32
    return %c0_i32, %c0_i32_0, %c0_i32_1 : i32, i32, i32
  }
  func.func @transform_9(%arg0: i32) -> (i32, i32, i32) {
    %c0_i32 = arith.constant 0 : i32
    %c0_i32_0 = arith.constant 0 : i32
    %c0_i32_1 = arith.constant 0 : i32
    %c0_i32_2 = arith.constant 0 : i32
    return %c0_i32, %c0_i32_0, %c0_i32_1 : i32, i32, i32
  }
  func.func @transform_10(%arg0: i32) -> (i32, i32, i32) {
    %c0_i32 = arith.constant 0 : i32
    %c0_i32_0 = arith.constant 0 : i32
    %c0_i32_1 = arith.constant 0 : i32
    %c0_i32_2 = arith.constant 0 : i32
    return %c0_i32, %c0_i32_0, %c0_i32_1 : i32, i32, i32
  }
  func.func @transform_11(%arg0: i32) -> (i32, i32) {
    %c0_i32 = arith.constant 0 : i32
    %c0_i32_0 = arith.constant 0 : i32
    %c0_i32_1 = arith.constant 0 : i32
    return %c0_i32, %c0_i32_0 : i32, i32
  }
  func.func @transform_12(%arg0: i32) -> (i32, i32, i32) {
    %c0_i32 = arith.constant 0 : i32
    %c0_i32_0 = arith.constant 0 : i32
    %c0_i32_1 = arith.constant 0 : i32
    return %arg0, %c0_i32, %c0_i32_0 : i32, i32, i32
  }
}

</mosaic_0001>

<bundles_post_ra>
// kernel: five_csp_conv_forward.1
= control target key start
LH: loop header
LB: loop body
LE: loop exit
PB: predicated region body
PF: predicated region fallthrough
CT: control target
= control target key end

     0   :  { %s1898_s21 = smov 0   ;;  %s2566_s0 = inlined_call_operand.vmem [shape: f32[2,8,256], index: 0, kind: input, shape index: {}]   ;;  %s2567_s1 = inlined_call_operand.vmem [shape: f32[8,256], index: 1, kind: input, shape index: {}]   ;;  %s2568_s2 = inlined_call_operand.vmem [shape: f32[4,8], index: 2, kind: input, shape index: {}]   ;;  %s2569_s3 = inlined_call_operand.vmem [shape: f32[4,1], index: 3, kind: input, shape index: {}]   ;;  %s2570_s4 = inlined_call_operand.vmem [shape: f32[2,4,9], index: 4, kind: input, shape index: {}]   ;;  %s2571_s5 = inlined_call_operand.vmem [shape: f32[2,4,1], index: 5, kind: input, shape index: {}]   ;;  %s2572_s6 = inlined_call_operand.vmem [shape: f32[2,4,4], index: 6, kind: input, shape index: {}]   ;;  %s2573_s7 = inlined_call_operand.vmem [shape: f32[4,1], index: 7, kind: input, shape index: {}]   ;;  %s2574_s8 = inlined_call_operand.vmem [shape: f32[2,4,9], index: 8, kind: input, shape index: {}]   ;;  %s2575_s9 = inlined_call_operand.vmem [shape: f32[2,4,1], index: 9, kind: input, shape index: {}]   ;;  %s2576_s10 = inlined_call_operand.vmem [shape: f32[2,4,4], index: 10, kind: input, shape index: {}]   ;;  %s2577_s11 = inlined_call_operand.vmem [shape: f32[4,1], index: 11, kind: input, shape index: {}]   ;;  %s2578_s12 = inlined_call_operand.vmem [shape: f32[2,4,256], index: 12, kind: output, shape index: {}]  }
   0x1 LB: > { %s1626_s22 = sadd.s32 4294967295, %s1814_s21   ;;  %p1630_p0 = scmp.ge.s32.totalorder %s1814_s21, 1  ;;  %s1814_s21 = sphi %s1898_s21, %s22_s21  }
   0x2   : > { %p362_p1 = scmp.lt.s32.totalorder %s1814_s21, 3 }
   0x4   : > { %p363_p2 = pnand %p1630_p0, %p362_p1 }
   0x6   : > { %366 = sbr.rel (%p363_p2) target bundleno = 723 (0x2d3), region = 68 }
   0xd   : > { %v418_v0 = vld [vmem:[%s2568_s2] sm:$0xf]  ;;  %v2583_v1 = vmov 2   ;;  %v2579_v2 = vmov 0   ;;  %v2581_v3 = vmov 3   ;;  %v2585_v4 = vmov 1  }
   0xe   : > { %1688 = vset.pattern.permute.xlu1 %v2583_v1  ;;  %1686 = vset.pattern.permute.xlu0 %v2579_v2  ;;  %v1820_v5 = vmov 4   ;;  %v1821_v6 = vmov 5   ;;  %v419_v7 = vld [vmem:[%s2569_s3] sm:$0xf]  ;;  %v1822_v8 = vmov 6   ;;  %v1823_v9 = vmov 7  }
   0xf   : > { %452 = vperm.xlu1 %1688, %v418_v0   ;;  %422 = vperm.xlu0 %1686, %v418_v0   ;;  %v706_v10 = vld [vmem:[%s2570_s4] sm:$0xf]  ;;  %v1639_v11 = vld [vmem:[%s2570_s4 + $0x4] sm:$0xf]  ;;  %v1824_v12 = vmov 8   ;;  %p404_p3 = scmp.lt.s32.totalorder %s1626_s22, 1  ;;  %v425_v13 = vlaneseq }
  0x10   : > { %s1825_s17 = smov 17   ;;  %s1826_s18 = smov 16  }
  0x11   : > { %s2622_s22 = smov (!%p404_p3, %s1626_s22), 1  ;;  %v426_v14 = vshrl.u32 %v425_v13, 7  ;;  %s1827_s19 = smov 15  }
  0x12   : > { %s1659_s13 = sshll.u32 %s2622_s22, 4  ;;  %s1828_s20 = smov 1  }
  0x13   : > { %1689 = vset.pattern.permute.xlu1 %v2581_v3  ;;  %1687 = vset.pattern.permute.xlu0 %v2585_v4  ;;  %s408_s16 = scalar_lea.vmem %s2566_s0, %s1659_s13  ;;  %v1955_v15 = vsub.s32 0, %v426_v14  ;;  %v1957_v16 = vsub.s32 1, %v426_v14  ;;  %v1959_v17 = vsub.s32 2, %v426_v14  ;;  %v1965_v22 = vsub.s32 3, %v426_v14  ;;  %s1829_s23 = smov 127  }
  0x14   : > { %468 = vperm.xlu1 %1689, %v418_v0   ;;  %436 = vperm.xlu0 %1687, %v418_v0   ;;  %v414_v20 = vld [vmem:[%s408_s16] sm:$0xff]  ;;  %v415_v21 = vld [vmem:[%s408_s16 + $0x8] sm:$0xff]  ;;  %v1971_v27 = vsub.s32 4, %v426_v14  ;;  %v1981_v34 = vsub.s32 5, %v426_v14  ;;  %v1993_v47 = vsub.s32 6, %v426_v14  ;;  %v2003_v58 = vsub.s32 7, %v426_v14 }
  0x15   : > { %v428_v23 = vrot.slane %v414_v20, %v1955_v15  ;;  %v432_v24 = vrot.slane %v415_v21, %v1955_v15  ;;  %v442_v25 = vrot.slane %v414_v20, %v1957_v16  ;;  %v446_v26 = vrot.slane %v415_v21, %v1957_v16  ;;  %s1830_s24 = smov 113   ;;  %s1831_s25 = smov 111  }
  0x16   : > { %v458_v28 = vrot.slane %v414_v20, %v1959_v17  ;;  %v462_v29 = vrot.slane %v415_v21, %v1959_v17  ;;  %v474_v31 = vrot.slane %v414_v20, %v1965_v22  ;;  %v478_v32 = vrot.slane %v415_v21, %v1965_v22  ;;  %s1832_s28 = smov 112   ;;  %s1660_s13 = sshll.u32 %s2622_s22, 3 }
  0x17   : > { %v490_v39 = vrot.slane %v414_v20, %v1971_v27  ;;  %v494_v40 = vrot.slane %v415_v21, %v1971_v27  ;;  %v506_v45 = vrot.slane %v414_v20, %v1981_v34  ;;  %v510_v46 = vrot.slane %v415_v21, %v1981_v34  ;;  %s413_s16 = scalar_lea.vmem %s2578_s12, %s1660_s13 }
  0x18   : > { %1690 = vset.pattern.permute.xlu1 %v1820_v5  ;;  %1691 = vset.pattern.permute.xlu0 %v1821_v6  ;;  %v522_v61 = vrot.slane %v414_v20, %v1993_v47  ;;  %v526_v62 = vrot.slane %v415_v21, %v1993_v47 }
  0x19   : > { %484 = vperm.xlu1 %1690, %v418_v0   ;;  %500 = vperm.xlu0 %1691, %v418_v0  }
  0x1d   : > { %1692 = vset.pattern.permute.xlu1 %v1822_v8  ;;  %1694 = vset.pattern.permute.xlu0 %v2579_v2 }
  0x1e   : > { %516 = vperm.xlu1 %1692, %v418_v0   ;;  %549 = vperm.xlu0 %1694, %v419_v7  }
  0x22   : > { %1693 = vset.pattern.permute.xlu1 %v1823_v9  ;;  %1697 = vset.pattern.permute.xlu0 %v2583_v1 }
  0x23   : > { %532 = vperm.xlu1 %1693, %v418_v0   ;;  %723 = vperm.xlu0 %1697, %v706_v10  }
  0x27   : > { %1695 = vset.pattern.permute.xlu1 %v2579_v2  ;;  %1700 = vset.pattern.permute.xlu0 %v2581_v3 }
  0x28   : > { %709 = vperm.xlu1 %1695, %v706_v10   ;;  %890 = vperm.xlu0 %1700, %v1639_v11  }
  0x2c   : > { %1696 = vset.pattern.permute.xlu1 %v2585_v4  ;;  %1701 = vset.pattern.permute.xlu0 %v1820_v5 }
  0x2d   : > { %715 = vperm.xlu1 %1696, %v706_v10   ;;  %739 = vperm.xlu0 %1701, %v706_v10  }
  0x31   : > { %874 = vperm.xlu1 %1696, %v1639_v11   ;;  %1704 = vset.pattern.permute.xlu0 %v1821_v6 }
  0x32   : > { %906 = vperm.xlu0 %1704, %v1639_v11  }
  0x35   : > { %1698 = vset.pattern.permute.xlu1 %v2583_v1 }
  0x36   : > { %882 = vperm.xlu1 %1698, %v1639_v11   ;;  %1706 = vset.pattern.permute.xlu0 %v1823_v9 }
  0x37   : > { %763 = vperm.xlu0 %1706, %v706_v10  }
  0x3a   : > { %1699 = vset.pattern.permute.xlu1 %v2581_v3 }
  0x3b   : > { %731 = vperm.xlu1 %1699, %v706_v10   ;;  %1709 = vset.pattern.permute.xlu0 %v1824_v12 }
  0x3c   : > { %930 = vperm.xlu0 %1709, %v1639_v11  }
  0x3f   : > { %1702 = vset.pattern.permute.xlu1 %v1820_v5 }
  0x40   : > { %898 = vperm.xlu1 %1702, %v1639_v11   ;;  %1710 = vset.pattern.permute.xlu0 %v2579_v2 }
  0x41   : > { %868 = vperm.xlu0 %1710, %v1639_v11  }
  0x44   : > { %1703 = vset.pattern.permute.xlu1 %v1821_v6 }
  0x45   : > { %747 = vperm.xlu1 %1703, %v706_v10  }
  0x49   : > { %1705 = vset.pattern.permute.xlu1 %v1822_v8 }
  0x4a   : > { %755 = vperm.xlu1 %1705, %v706_v10  }
  0x4e   : > { %914 = vperm.xlu1 %1705, %v1639_v11  }
  0x52   : > { %1707 = vset.pattern.permute.xlu1 %v1823_v9 }
  0x53   : > { %922 = vperm.xlu1 %1707, %v1639_v11   ;;  %v542_v11 = vrot.slane %v415_v21, %v2003_v58 }
  0x57   : > { %1708 = vset.pattern.permute.xlu1 %v1824_v12 }
  0x58   : > { %771 = vperm.xlu1 %1708, %v706_v10   ;;  %v538_v10 = vrot.slane %v414_v20, %v2003_v58 }
  0x5c   : > { %1711 = vset.pattern.permute.xlu1 %v2579_v2 }
  0x8e   : > { %v1961_v18 = vpop.permute.xlu1 %452  ;;  %v1963_v19 = vpop.permute.xlu0 %422 }
  0x8f   : > { %v433_v35 = vmul.f32 %v428_v23, %v1963_v19  ;;  %v434_v36 = vmul.f32 %v432_v24, %v1963_v19  ;;  %v463_v41 = vmul.f32 %v458_v28, %v1961_v18  ;;  %v464_v42 = vmul.f32 %v462_v29, %v1961_v18 }
  0x93   : > { %v1975_v30 = vpop.permute.xlu1 %468  ;;  %v1979_v33 = vpop.permute.xlu0 %436 }
  0x94   : > { %v447_v37 = vmul.f32 %v442_v25, %v1979_v33  ;;  %v448_v38 = vmul.f32 %v446_v26, %v1979_v33  ;;  %v479_v48 = vmul.f32 %v474_v31, %v1975_v30  ;;  %v480_v49 = vmul.f32 %v478_v32, %v1975_v30 }
  0x96   : > { %v449_v43 = vadd.f32 %v447_v37, %v433_v35  ;;  %v450_v44 = vadd.f32 %v448_v38, %v434_v36 }
  0x98   : > { %v465_v50 = vadd.f32 %v463_v41, %v449_v43  ;;  %v466_v51 = vadd.f32 %v464_v42, %v450_v44  ;;  %v1997_v52 = vpop.permute.xlu1 %484  ;;  %v1999_v53 = vpop.permute.xlu0 %500 }
  0x99   : > { %2599 = vst [vmem:[#allocation2_spill] sm:$0xff] %v1997_v52  ;;  %2600 = vst [vmem:[#allocation3_spill] sm:$0xff] %v1999_v53  ;;  %v495_v54 = vmul.f32 %v490_v39, %v1997_v52  ;;  %v496_v55 = vmul.f32 %v494_v40, %v1997_v52  ;;  %v511_v59 = vmul.f32 %v506_v45, %v1999_v53 }
  0x9a   : > { %v481_v56 = vadd.f32 %v479_v48, %v465_v50  ;;  %v482_v57 = vadd.f32 %v480_v49, %v466_v51  ;;  %v512_v60 = vmul.f32 %v510_v46, %v1999_v53 }
  0x9c   : > { %v497_v63 = vadd.f32 %v495_v54, %v481_v56  ;;  %v498_v0 = vadd.f32 %v496_v55, %v482_v57 }
  0x9d   : > { %v2009_v7 = vpop.permute.xlu1 %516  ;;  %v2019_v35 = vpop.permute.xlu0 %549 }
  0x9e   : > { %2601 = vst [vmem:[#allocation4_spill] sm:$0xff] %v2009_v7  ;;  %v513_v23 = vadd.f32 %v511_v59, %v497_v63  ;;  %v514_v24 = vadd.f32 %v512_v60, %v498_v0  ;;  %v527_v14 = vmul.f32 %v522_v61, %v2009_v7  ;;  %v528_v25 = vmul.f32 %v526_v62, %v2009_v7 }
  0x9f   : > { %2603 = vst [vmem:[#allocation6_spill] sm:$0xff] %v2019_v35 }
  0xa0   : > { %v529_v31 = vadd.f32 %v527_v14, %v513_v23  ;;  %v530_v32 = vadd.f32 %v528_v25, %v514_v24 }
  0xa2   : > { %v2015_v26 = vpop.permute.xlu1 %532 }
  0xa3   : > { %2602 = vst [vmem:[#allocation5_spill] sm:$0xff] %v2015_v26  ;;  %v543_v28 = vmul.f32 %v538_v10, %v2015_v26  ;;  %v544_v29 = vmul.f32 %v542_v11, %v2015_v26 }
  0xa5   : > { %v545_v36 = vadd.f32 %v543_v28, %v529_v31  ;;  %v546_v20 = vadd.f32 %v544_v29, %v530_v32  ;;  %v1640_v29 = vld [vmem:[%s2571_s5 + $0x4] sm:$0xf]  ;;  %v2105_v32 = vld [vmem:[%s2574_s8] sm:$0xf] }
  0xa6   : > { %v1643_v31 = vld [vmem:[%s2572_s6 + $0x4] sm:$0xf] }
  0xa7   : > { %v552_v21 = vadd.f32 %v2019_v35, %v545_v36  ;;  %v553_v37 = vadd.f32 %v2019_v35, %v546_v20  ;;  %v2110_v36 = vpop.permute.xlu1 %709  ;;  %v1648_v20 = vld [vmem:[%s2574_s8 + $0x4] sm:$0xf] }
  0xa9   : > { %v1635_v38 = vmul.f32 -1.442695, %v552_v21  ;;  %v1636_v39 = vmul.f32 -1.442695, %v553_v37 }
  0xab   : > { %1744 = vpow2.f32 %v1635_v38  ;;  %v1027_v38 = vld [vmem:[%s2573_s7] sm:$0xf] }
  0xac   : > { %1746 = vpow2.f32 %v1636_v39 }
  0xb5   : > { %v1745_v40 = vpop.eup %1744 }
  0xb6   : > { %v1747_v41 = vpop.eup %1746  ;;  %v560_v42 = vadd.f32 1.0, %v1745_v40 }
  0xb7   : > { %v561_v43 = vadd.f32 1.0, %v1747_v41  ;;  %v2139_v41 = vpop.permute.xlu0 %723 }
  0xb8   : > { %1748 = vrcp.f32 %v560_v42 }
  0xb9   : > { %1750 = vrcp.f32 %v561_v43 }
  0xbb   : > { %v2145_v43 = vpop.permute.xlu0 %890 }
  0xc2   : > { %v1749_v44 = vpop.eup %1748 }
  0xc3   : > { %v1751_v45 = vpop.eup %1750  ;;  %v2023_v46 = vmul.f32 %v1749_v44, %v552_v21  ;;  %v2118_v21 = vpop.permute.xlu1 %715 }
  0xc4   : > { %v2025_v48 = vmul.f32 %v1751_v45, %v553_v37  ;;  %v2150_v45 = vpop.permute.xlu0 %739 }
  0xc5   : > { %568 = vrot.lane.b32.xlu1 %v2023_v46, %s1825_s17  ;;  %v1459_v49 = vrot.slane %v2023_v46, %v1955_v15  ;;  %v1469_v50 = vrot.slane %v2023_v46, %v1957_v16  ;;  %v1481_v57 = vrot.slane %v2023_v46, %v1959_v17  ;;  %v1493_v0 = vrot.slane %v2023_v46, %v1965_v22 }
  0xc6   : > { %570 = vrot.lane.b32.xlu0 %v2025_v48, %s1825_s17  ;;  %v1463_v51 = vrot.slane %v2025_v48, %v1955_v15  ;;  %v1473_v54 = vrot.slane %v2025_v48, %v1957_v16  ;;  %v1485_v59 = vrot.slane %v2025_v48, %v1959_v17  ;;  %v1497_v10 = vrot.slane %v2025_v48, %v1965_v22 }
  0xc7   : > { %v1464_v55 = vmul.f32 %v1459_v49, %v1963_v19  ;;  %v1474_v56 = vmul.f32 %v1469_v50, %v1979_v33  ;;  %v1486_v63 = vmul.f32 %v1481_v57, %v1961_v18  ;;  %v1498_v24 = vmul.f32 %v1493_v0, %v1975_v30  ;;  %v2123_v37 = vpop.permute.xlu1 %874 }
  0xc8   : > { %v1465_v60 = vmul.f32 %v1463_v51, %v1963_v19  ;;  %v1475_v61 = vmul.f32 %v1473_v54, %v1979_v33  ;;  %v1487_v19 = vmul.f32 %v1485_v59, %v1961_v18  ;;  %v1499_v14 = vmul.f32 %v1497_v10, %v1975_v30  ;;  %v778_v18 = vld [vmem:[%s2571_s5] sm:$0xf]  ;;  %v2156_v50 = vpop.permute.xlu0 %906 }
  0xc9   : > { %587 = vrot.lane.b32.xlu1 %v2023_v46, %s1826_s18  ;;  %v1476_v62 = vadd.f32 %v1474_v56, %v1464_v55  ;;  %v800_v30 = vld [vmem:[%s2572_s6] sm:$0xf] }
  0xca   : > { %589 = vrot.lane.b32.xlu0 %v2025_v48, %s1826_s18  ;;  %v1477_v11 = vadd.f32 %v1475_v61, %v1465_v60 }
  0xcb   : > { %v1488_v23 = vadd.f32 %v1486_v63, %v1476_v62  ;;  %v2131_v39 = vpop.permute.xlu1 %882  ;;  %v2185_v63 = vld [vmem:[%s2567_s1] sm:$0xff] }
  0xcc   : > { %v1489_v33 = vadd.f32 %v1487_v19, %v1477_v11  ;;  %v2161_v54 = vpop.permute.xlu0 %763  ;;  %v2205_v10 = vrot.slane %v2185_v63, %v1955_v15  ;;  %v2280_v53 = vrot.slane %v2185_v63, %v1981_v34 }
  0xcd   : > { %604 = vrot.lane.b32.xlu1 %v2023_v46, %s1827_s19  ;;  %v2063_v25 = vadd.f32 %v1498_v24, %v1488_v23 }
  0xce   : > { %623 = vrot.lane.b32.xlu0 %v2025_v48, %s1828_s20  ;;  %v2065_v28 = vadd.f32 %v1499_v14, %v1489_v33  ;;  %v2217_v33 = vrot.slane %v2185_v63, %v1959_v17 }
  0xcf   : > { %2604 = vst [vmem:[#allocation7_spill] sm:$0xff] %v2063_v25  ;;  %v2136_v40 = vpop.permute.xlu1 %731 }
  0xd0   : > { %2605 = vst [vmem:[#allocation8_spill] sm:$0xff] %v2065_v28  ;;  %v2167_v56 = vpop.permute.xlu0 %930 }
  0xd1   : > { %606 = vrot.lane.b32.xlu1 %v2025_v48, %s1827_s19 }
  0xd2   : > { %638 = vrot.lane.b32.xlu0 %v2023_v46, %s1829_s23 }
  0xd3   : > { %v2142_v42 = vpop.permute.xlu1 %898 }
  0xd5   : > { %621 = vrot.lane.b32.xlu1 %v2023_v46, %s1828_s20 }
  0xd6   : > { %657 = vrot.lane.b32.xlu0 %v2025_v48, %s1830_s24 }
  0xd7   : > { %v2147_v44 = vpop.permute.xlu1 %747 }
  0xd9   : > { %640 = vrot.lane.b32.xlu1 %v2025_v48, %s1829_s23 }
  0xda   : > { %689 = vrot.lane.b32.xlu0 %v2023_v46, %s1831_s25 }
  0xdb   : > { %v2152_v49 = vpop.permute.xlu1 %755 }
  0xdd   : > { %655 = vrot.lane.b32.xlu1 %v2023_v46, %s1830_s24 }
  0xde   : > { %781 = vperm.xlu0 %1710, %v778_v18  }
  0xdf   : > { %v2159_v51 = vpop.permute.xlu1 %914 }
  0xe1   : > { %672 = vrot.lane.b32.xlu1 %v2023_v46, %s1832_s28 }
  0xe2   : > { %1712 = vset.pattern.permute.xlu0 %v2585_v4 }
  0xe3   : > { %817 = vperm.xlu0 %1712, %v800_v30   ;;  %v2165_v55 = vpop.permute.xlu1 %922 }
  0xe5   : > { %674 = vrot.lane.b32.xlu1 %v2025_v48, %s1832_s28 }
  0xe7   : > { %1714 = vset.pattern.permute.xlu0 %v2583_v1  ;;  %v2171_v57 = vpop.permute.xlu1 %771 }
  0xe8   : > { %833 = vperm.xlu0 %1714, %v800_v30  }
  0xe9   : > { %691 = vrot.lane.b32.xlu1 %v2025_v48, %s1831_s25 }
  0xec   : > { %1717 = vset.pattern.permute.xlu0 %v2581_v3 }
  0xed   : > { %941 = vperm.xlu1 %1711, %v1640_v29   ;;  %1010 = vperm.xlu0 %1717, %v1643_v31  }
  0xf1   : > { %803 = vperm.xlu1 %1711, %v800_v30   ;;  %1719 = vset.pattern.permute.xlu0 %v2585_v4 }
  0xf2   : > { %1122 = vperm.xlu0 %1719, %v2105_v32  }
  0xf5   : > { %964 = vperm.xlu1 %1711, %v1643_v31  }
  0xf6   : > { %1721 = vset.pattern.permute.xlu0 %v2583_v1 }
  0xf7   : > { %1130 = vperm.xlu0 %1721, %v2105_v32  }
  0xf9   : > { %1713 = vset.pattern.permute.xlu1 %v2585_v4 }
  0xfa   : > { %978 = vperm.xlu1 %1713, %v1643_v31  }
  0xfb   : > { %1724 = vset.pattern.permute.xlu0 %v2581_v3 }
  0xfc   : > { %1297 = vperm.xlu0 %1724, %v1648_v20  }
  0xfe   : > { %1715 = vset.pattern.permute.xlu1 %v2583_v1 }
  0xff   : > { %994 = vperm.xlu1 %1715, %v1643_v31  }
 0x100   : > { %1725 = vset.pattern.permute.xlu0 %v1820_v5 }
 0x101   : > { %1146 = vperm.xlu0 %1725, %v2105_v32  }
 0x103   : > { %1716 = vset.pattern.permute.xlu1 %v2581_v3 }
 0x104   : > { %849 = vperm.xlu1 %1716, %v800_v30  }
 0x105   : > { %1728 = vset.pattern.permute.xlu0 %v1821_v6 }
 0x106   : > { %1313 = vperm.xlu0 %1728, %v1648_v20  }
 0x108   : > { %1718 = vset.pattern.permute.xlu1 %v2579_v2 }
 0x109   : > { %1030 = vperm.xlu1 %1718, %v1027_v38  }
 0x10a   : > { %1730 = vset.pattern.permute.xlu0 %v1823_v9 }
 0x10b   : > { %1170 = vperm.xlu0 %1730, %v2105_v32  }
 0x10d   : > { %1116 = vperm.xlu1 %1718, %v2105_v32  }
 0x10f   : > { %1733 = vset.pattern.permute.xlu0 %v1824_v12 }
 0x110   : > { %1337 = vperm.xlu0 %1733, %v1648_v20  }
 0x111   : > { %1275 = vperm.xlu1 %1718, %v1648_v20  }
 0x114   : > { %1734 = vset.pattern.permute.xlu0 %v2579_v2 }
 0x115   : > { %1720 = vset.pattern.permute.xlu1 %v2585_v4 }
 0x116   : > { %1281 = vperm.xlu1 %1720, %v1648_v20  }
 0x11a   : > { %1722 = vset.pattern.permute.xlu1 %v2583_v1 }
 0x11b   : > { %1289 = vperm.xlu1 %1722, %v1648_v20  }
 0x11f   : > { %1723 = vset.pattern.permute.xlu1 %v2581_v3 }
 0x120   : > { %1138 = vperm.xlu1 %1723, %v2105_v32  }
 0x124   : > { %1726 = vset.pattern.permute.xlu1 %v1820_v5  ;;  %v2173_v5 = vpop.permute.xlu0 %868 }
 0x125   : > { %1305 = vperm.xlu1 %1726, %v1648_v20  }
 0x129   : > { %1727 = vset.pattern.permute.xlu1 %v1821_v6 }
 0x12a   : > { %1154 = vperm.xlu1 %1727, %v2105_v32  }
 0x12e   : > { %1729 = vset.pattern.permute.xlu1 %v1822_v8  ;;  %v2179_v8 = vand.u32 127, %v425_v13  ;;  %v2196_v13 = vrot.slane %v2185_v63, %v1957_v16 }
 0x12f   : > { %1162 = vperm.xlu1 %1729, %v2105_v32  }
 0x130   : > { %vm591_vm0 = vcmp.lt.s32.totalorder %v2179_v8, 16  ;;  %vm574_vm1 = vcmp.lt.s32.totalorder %v2179_v8, 17  ;;  %vm608_vm2 = vcmp.lt.s32.totalorder %v2179_v8, 15  ;;  %vm625_vm3 = vcmp.lt.s32.totalorder %v2179_v8, 1 }
 0x131   : > { %vm642_vm4 = vcmp.lt.s32.totalorder %v2179_v8, 127  ;;  %vm659_vm5 = vcmp.lt.s32.totalorder %v2179_v8, 113  ;;  %vm676_vm6 = vcmp.lt.s32.totalorder %v2179_v8, 112  ;;  %vm693_vm7 = vcmp.lt.s32.totalorder %v2179_v8, 111 }
 0x133   : > { %1321 = vperm.xlu1 %1729, %v1648_v20  }
 0x137   : > { %v569_v59 = vpop.permute.xlu1 %568  ;;  %1731 = vset.pattern.permute.xlu1 %v1823_v9  ;;  %v2191_v9 = vld [vmem:[%s2567_s1 + $0x8] sm:$0xff] }
 0x138   : > { %1329 = vperm.xlu1 %1731, %v1648_v20   ;;  %v571_v6 = vpop.permute.xlu0 %570  ;;  %v2200_v0 = vrot.slane %v2191_v9, %v1957_v16  ;;  %v2213_v23 = vrot.slane %v2191_v9, %v1955_v15  ;;  %v2221_v14 = vrot.slane %v2191_v9, %v1959_v17 }
 0x139   : > { %v575_v18 = vsel %vm574_vm1, %v569_v59, %v571_v6  ;;  %v576_v30 = vsel %vm574_vm1, %v571_v6, %v569_v59 }
 0x13b   : > { %v588_v60 = vpop.permute.xlu1 %587 }
 0x13c   : > { %1732 = vset.pattern.permute.xlu1 %v1824_v12  ;;  %v590_v62 = vpop.permute.xlu0 %589 }
 0x13d   : > { %1178 = vperm.xlu1 %1732, %v2105_v32   ;;  %v592_v11 = vsel %vm591_vm0, %v588_v60, %v590_v62  ;;  %v593_v19 = vsel %vm591_vm0, %v590_v62, %v588_v60  ;;  %v2236_v60 = vrot.slane %v2185_v63, %v1965_v22  ;;  %v2240_v62 = vrot.slane %v2191_v9, %v1965_v22 }
 0x13e   : > { %v602_v20 = vmul.f32 %v2196_v13, %v593_v19  ;;  %v603_v38 = vmul.f32 %v2200_v0, %v592_v11 }
 0x13f   : > { %v605_v61 = vpop.permute.xlu1 %604  ;;  %2606 = vst [vmem:[#allocation9_spill] sm:$0xff] %v2236_v60  ;;  %2607 = vst [vmem:[#allocation10_spill] sm:$0xff] %v2240_v62 }
 0x140   : > { %v624_v24 = vpop.permute.xlu0 %623  ;;  %v718_v3 = vmul.f32 %v2118_v21, %v602_v20  ;;  %v719_v1 = vmul.f32 %v2118_v21, %v603_v38  ;;  %v743_v21 = vmul.f32 %v2150_v45, %v2025_v48 }
 0x141   : > { %1735 = vset.pattern.permute.xlu1 %v2579_v2 }
 0x143   : > { %v607_v12 = vpop.permute.xlu1 %606 }
 0x144   : > { %v609_v29 = vsel %vm608_vm2, %v605_v61, %v607_v12  ;;  %v610_v31 = vsel %vm608_vm2, %v607_v12, %v605_v61  ;;  %v585_v61 = vmul.f32 %v2205_v10, %v576_v30  ;;  %v586_v12 = vmul.f32 %v2213_v23, %v575_v18  ;;  %v639_v4 = vpop.permute.xlu0 %638 }
 0x145   : > { %v619_v11 = vmul.f32 %v2217_v33, %v610_v31  ;;  %v620_v19 = vmul.f32 %v2221_v14, %v609_v29 }
 0x146   : > { %v712_v18 = vmul.f32 %v2110_v36, %v585_v61  ;;  %v713_v30 = vmul.f32 %v2110_v36, %v586_v12 }
 0x147   : > { %v622_v32 = vpop.permute.xlu1 %621  ;;  %v726_v29 = vmul.f32 %v2139_v41, %v619_v11  ;;  %v727_v31 = vmul.f32 %v2139_v41, %v620_v19 }
 0x148   : > { %v626_v59 = vsel %vm625_vm3, %v622_v32, %v624_v24  ;;  %v627_v6 = vsel %vm625_vm3, %v624_v24, %v622_v32  ;;  %v742_v24 = vmul.f32 %v2150_v45, %v2023_v46  ;;  %v2265_v32 = vrot.slane %v2185_v63, %v1971_v27 }
 0x149   : > { %v636_v35 = vmul.f32 %v2236_v60, %v627_v6  ;;  %v637_v28 = vmul.f32 %v2240_v62, %v626_v59  ;;  %v2269_v59 = vrot.slane %v2191_v9, %v1971_v27  ;;  %v720_v25 = vadd.f32 %v718_v3, %v712_v18  ;;  %v658_v18 = vpop.permute.xlu0 %657 }
 0x14a   : > { %v721_v36 = vadd.f32 %v719_v1, %v713_v30  ;;  %v2284_v27 = vrot.slane %v2191_v9, %v1981_v34  ;;  %v877_v30 = vmul.f32 %v2123_v37, %v602_v20  ;;  %v871_v62 = vmul.f32 %v2173_v5, %v585_v61 }
 0x14b   : > { %v641_v2 = vpop.permute.xlu1 %640  ;;  %v734_v26 = vmul.f32 %v2136_v40, %v636_v35  ;;  %v735_v41 = vmul.f32 %v2136_v40, %v637_v28  ;;  %v728_v3 = vadd.f32 %v726_v29, %v720_v25  ;;  %v2289_v40 = vrot.slane %v2185_v63, %v1993_v47 }
 0x14c   : > { %v643_v45 = vsel %vm642_vm4, %v639_v4, %v641_v2  ;;  %v644_v7 = vsel %vm642_vm4, %v641_v2, %v639_v4  ;;  %v729_v1 = vadd.f32 %v727_v31, %v721_v36  ;;  %v878_v2 = vmul.f32 %v2123_v37, %v603_v38 }
 0x14d   : > { %v736_v25 = vadd.f32 %v734_v26, %v728_v3  ;;  %v653_v31 = vmul.f32 %v2265_v32, %v643_v45  ;;  %v654_v36 = vmul.f32 %v2269_v59, %v644_v7  ;;  %v872_v60 = vmul.f32 %v2173_v5, %v586_v12 }
 0x14e   : > { %v737_v29 = vadd.f32 %v735_v41, %v729_v1  ;;  %v2303_v37 = vrot.slane %v2191_v9, %v1993_v47  ;;  %v2310_v26 = vrot.slane %v2185_v63, %v2003_v58  ;;  %v2314_v7 = vrot.slane %v2191_v9, %v2003_v58 }
 0x14f   : > { %v656_v6 = vpop.permute.xlu1 %655  ;;  %v879_v61 = vadd.f32 %v877_v30, %v871_v62  ;;  %v880_v5 = vadd.f32 %v878_v2, %v872_v60  ;;  %v885_v12 = vmul.f32 %v2131_v39, %v619_v11  ;;  %v886_v47 = vmul.f32 %v2131_v39, %v620_v19 }
 0x150   : > { %v660_v4 = vsel %vm659_vm5, %v656_v6, %v658_v18  ;;  %v661_v34 = vsel %vm659_vm5, %v658_v18, %v656_v6  ;;  %v745_v41 = vadd.f32 %v743_v21, %v737_v29  ;;  %v744_v45 = vadd.f32 %v742_v24, %v736_v25 }
 0x151   : > { %v670_v20 = vmul.f32 %v2280_v53, %v660_v4  ;;  %v671_v38 = vmul.f32 %v2284_v27, %v661_v34  ;;  %v750_v3 = vmul.f32 %v2147_v44, %v653_v31  ;;  %v751_v1 = vmul.f32 %v2147_v44, %v654_v36 }
 0x152   : > { %v893_v63 = vmul.f32 %v2145_v43, %v636_v35  ;;  %v894_v18 = vmul.f32 %v2145_v43, %v637_v28  ;;  %v887_v19 = vadd.f32 %v885_v12, %v879_v61  ;;  %v888_v44 = vadd.f32 %v886_v47, %v880_v5  ;;  %v690_v35 = vpop.permute.xlu0 %689 }
 0x153   : > { %v673_v52 = vpop.permute.xlu1 %672  ;;  %v758_v60 = vmul.f32 %v2152_v49, %v670_v20  ;;  %v759_v39 = vmul.f32 %v2152_v49, %v671_v38  ;;  %v752_v21 = vadd.f32 %v750_v3, %v744_v45  ;;  %v753_v28 = vadd.f32 %v751_v1, %v745_v41 }
 0x154   : > { %v895_v2 = vadd.f32 %v893_v63, %v887_v19  ;;  %v901_v5 = vmul.f32 %v2142_v42, %v2023_v46  ;;  %v909_v1 = vmul.f32 %v2156_v50, %v653_v31  ;;  %v910_v63 = vmul.f32 %v2156_v50, %v654_v36 }
 0x155   : > { %v760_v34 = vadd.f32 %v758_v60, %v752_v21  ;;  %v761_v25 = vadd.f32 %v759_v39, %v753_v28  ;;  %v918_v46 = vmul.f32 %v2159_v51, %v671_v38 }
 0x156   : > { %v903_v3 = vadd.f32 %v901_v5, %v895_v2 }
 0x157   : > { %v675_v6 = vpop.permute.xlu1 %674 }
 0x158   : > { %v677_v58 = vsel %vm676_vm6, %v673_v52, %v675_v6  ;;  %v678_v9 = vsel %vm676_vm6, %v675_v6, %v673_v52  ;;  %v896_v52 = vadd.f32 %v894_v18, %v888_v44  ;;  %v911_v39 = vadd.f32 %v909_v1, %v903_v3 }
 0x159   : > { %v687_v62 = vmul.f32 %v2289_v40, %v677_v58  ;;  %v688_v11 = vmul.f32 %v2303_v37, %v678_v9  ;;  %v917_v9 = vmul.f32 %v2159_v51, %v670_v20 }
 0x15b   : > { %v692_v24 = vpop.permute.xlu1 %691  ;;  %v766_v43 = vmul.f32 %v2161_v54, %v687_v62  ;;  %v767_v30 = vmul.f32 %v2161_v54, %v688_v11  ;;  %v902_v54 = vmul.f32 %v2142_v42, %v2025_v48  ;;  %v926_v44 = vmul.f32 %v2165_v55, %v688_v11 }
 0x15c   : > { %v694_v4 = vsel %vm693_vm7, %v690_v35, %v692_v24  ;;  %v695_v49 = vsel %vm693_vm7, %v692_v24, %v690_v35  ;;  %v919_v31 = vadd.f32 %v917_v9, %v911_v39 }
 0x15d   : > { %v704_v29 = vmul.f32 %v2310_v26, %v694_v4  ;;  %v705_v61 = vmul.f32 %v2314_v7, %v695_v49  ;;  %v768_v6 = vadd.f32 %v766_v43, %v760_v34  ;;  %v769_v41 = vadd.f32 %v767_v30, %v761_v25  ;;  %v782_v60 = vpop.permute.xlu0 %781 }
 0x15e   : > { %v904_v45 = vadd.f32 %v902_v54, %v896_v52 }
 0x15f   : > { %v774_v12 = vmul.f32 %v2171_v57, %v704_v29  ;;  %v775_v47 = vmul.f32 %v2171_v57, %v705_v61  ;;  %v925_v57 = vmul.f32 %v2165_v55, %v687_v62  ;;  %v933_v50 = vmul.f32 %v2167_v56, %v704_v29 }
 0x160   : > { %v912_v19 = vadd.f32 %v910_v63, %v904_v45  ;;  %v934_v36 = vmul.f32 %v2167_v56, %v705_v61 }
 0x161   : > { %v776_v18 = vadd.f32 %v774_v12, %v768_v6  ;;  %v777_v58 = vadd.f32 %v775_v47, %v769_v41  ;;  %v927_v20 = vadd.f32 %v925_v57, %v919_v31 }
 0x162   : > { %v920_v21 = vadd.f32 %v918_v46, %v912_v19  ;;  %v818_v63 = vpop.permute.xlu0 %817 }
 0x163   : > { %v784_v48 = vadd.f32 %v782_v60, %v776_v18  ;;  %v785_v42 = vadd.f32 %v782_v60, %v777_v58  ;;  %v935_v28 = vadd.f32 %v933_v50, %v927_v20 }
 0x164   : > { %v928_v51 = vadd.f32 %v926_v44, %v920_v21 }
 0x165   : > { %v1637_v24 = vmul.f32 -1.442695, %v784_v48  ;;  %v1638_v35 = vmul.f32 -1.442695, %v785_v42 }
 0x166   : > { %v936_v38 = vadd.f32 %v934_v36, %v928_v51 }
 0x167   : > { %1752 = vpow2.f32 %v1637_v24  ;;  %v834_v24 = vpop.permute.xlu0 %833 }
 0x168   : > { %1754 = vpow2.f32 %v1638_v35 }
 0x16c   : > { %v942_v43 = vpop.permute.xlu1 %941 }
 0x16d   : > { %v944_v30 = vadd.f32 %v942_v43, %v935_v28  ;;  %v945_v2 = vadd.f32 %v942_v43, %v936_v38 }
 0x16f   : > { %v1641_v62 = vmul.f32 -1.442695, %v944_v30  ;;  %v1642_v52 = vmul.f32 -1.442695, %v945_v2 }
 0x170   : > { %v804_v56 = vpop.permute.xlu1 %803 }
 0x171   : > { %1756 = vpow2.f32 %v1641_v62  ;;  %v1753_v55 = vpop.eup %1752 }
 0x172   : > { %1758 = vpow2.f32 %v1642_v52  ;;  %v1755_v11 = vpop.eup %1754  ;;  %v792_v4 = vadd.f32 1.0, %v1753_v55 }
 0x173   : > { %v793_v49 = vadd.f32 1.0, %v1755_v11 }
 0x174   : > { %1760 = vrcp.f32 %v792_v4  ;;  %v965_v5 = vpop.permute.xlu1 %964 }
 0x175   : > { %1762 = vrcp.f32 %v793_v49 }
 0x179   : > { %v979_v41 = vpop.permute.xlu1 %978 }
 0x17b   : > { %v1757_v34 = vpop.eup %1756 }
 0x17c   : > { %v1759_v25 = vpop.eup %1758  ;;  %v952_v29 = vadd.f32 1.0, %v1757_v34  ;;  %v1011_v34 = vpop.permute.xlu0 %1010 }
 0x17d   : > { %v953_v61 = vadd.f32 1.0, %v1759_v25 }
 0x17e   : > { %1764 = vrcp.f32 %v952_v29  ;;  %v1761_v54 = vpop.eup %1760  ;;  %v995_v19 = vpop.permute.xlu1 %994 }
 0x17f   : > { %1766 = vrcp.f32 %v953_v61  ;;  %v1763_v12 = vpop.eup %1762  ;;  %v798_v47 = vmul.f32 %v1761_v54, %v784_v48 }
 0x180   : > { %v799_v6 = vmul.f32 %v1763_v12, %v785_v42 }
 0x181   : > { %v809_v45 = vrot.slane %v798_v47, %v1955_v15  ;;  %v823_v3 = vrot.slane %v798_v47, %v1957_v16  ;;  %v839_v48 = vrot.slane %v798_v47, %v1959_v17  ;;  %v855_v21 = vrot.slane %v798_v47, %v1965_v22 }
 0x182   : > { %v813_v1 = vrot.slane %v799_v6, %v1955_v15  ;;  %v827_v18 = vrot.slane %v799_v6, %v1957_v16  ;;  %v843_v35 = vrot.slane %v799_v6, %v1959_v17  ;;  %v859_v31 = vrot.slane %v799_v6, %v1965_v22 }
 0x183   : > { %v814_v58 = vmul.f32 %v809_v45, %v804_v56  ;;  %v828_v9 = vmul.f32 %v823_v3, %v818_v63  ;;  %v844_v52 = vmul.f32 %v839_v48, %v834_v24 }
 0x184   : > { %v815_v60 = vmul.f32 %v813_v1, %v804_v56  ;;  %v829_v39 = vmul.f32 %v827_v18, %v818_v63  ;;  %v845_v49 = vmul.f32 %v843_v35, %v834_v24  ;;  %v850_v56 = vpop.permute.xlu1 %849 }
 0x185   : > { %v830_v51 = vadd.f32 %v828_v9, %v814_v58  ;;  %v860_v3 = vmul.f32 %v855_v21, %v850_v56  ;;  %v861_v18 = vmul.f32 %v859_v31, %v850_v56  ;;  %v1434_v56 = vld [vmem:[%s2577_s11] sm:$0xf] }
 0x186   : > { %v831_v43 = vadd.f32 %v829_v39, %v815_v60 }
 0x187   : > { %v846_v54 = vadd.f32 %v844_v52, %v830_v51  ;;  %v2610_v52 = vmov 3  }
 0x188   : > { %v1765_v46 = vpop.eup %1764  ;;  %v847_v6 = vadd.f32 %v845_v49, %v831_v43  ;;  %v2608_v43 = vmov 1  }
 0x189   : > { %v1767_v57 = vpop.eup %1766  ;;  %v958_v44 = vmul.f32 %v1765_v46, %v944_v30  ;;  %v862_v9 = vadd.f32 %v860_v3, %v846_v54 }
 0x18a   : > { %v959_v42 = vmul.f32 %v1767_v57, %v945_v2  ;;  %v1031_v57 = vpop.permute.xlu1 %1030 }
 0x18b   : > { %v970_v50 = vrot.slane %v958_v44, %v1955_v15  ;;  %v984_v36 = vrot.slane %v958_v44, %v1957_v16  ;;  %v1000_v20 = vrot.slane %v958_v44, %v1959_v17  ;;  %v1016_v55 = vrot.slane %v958_v44, %v1965_v22 }
 0x18c   : > { %v974_v38 = vrot.slane %v959_v42, %v1955_v15  ;;  %v988_v28 = vrot.slane %v959_v42, %v1957_v16  ;;  %v1004_v30 = vrot.slane %v959_v42, %v1959_v17  ;;  %v1020_v25 = vrot.slane %v959_v42, %v1965_v22 }
 0x18d   : > { %v975_v2 = vmul.f32 %v970_v50, %v965_v5  ;;  %v989_v62 = vmul.f32 %v984_v36, %v979_v41  ;;  %v1005_v61 = vmul.f32 %v1000_v20, %v995_v19  ;;  %v1021_v1 = vmul.f32 %v1016_v55, %v1011_v34 }
 0x18e   : > { %v976_v11 = vmul.f32 %v974_v38, %v965_v5  ;;  %v990_v4 = vmul.f32 %v988_v28, %v979_v41  ;;  %v1006_v47 = vmul.f32 %v1004_v30, %v995_v19  ;;  %v1022_v58 = vmul.f32 %v1020_v25, %v1011_v34  ;;  %v1185_v38 = vld [vmem:[%s2575_s9] sm:$0xf] }
 0x18f   : > { %v991_v29 = vadd.f32 %v989_v62, %v975_v2  ;;  %v863_v41 = vadd.f32 %v861_v18, %v847_v6  ;;  %v1207_v28 = vld [vmem:[%s2576_s10] sm:$0xf]  ;;  %v2609_v30 = vmov 2   ;;  %v1649_v2 = vld [vmem:[%s2575_s9 + $0x4] sm:$0xf]  ;;  %v2611_v55 = vmov 0  }
 0x190   : > { %v992_v12 = vadd.f32 %v990_v4, %v976_v11  ;;  %v1652_v62 = vld [vmem:[%s2576_s10 + $0x4] sm:$0xf]  ;;  %v2420_v11 = vpop.permute.xlu1 %1116 }
 0x191   : > { %v1007_v45 = vadd.f32 %v1005_v61, %v991_v29  ;;  %v1123_v29 = vpop.permute.xlu0 %1122 }
 0x192   : > { %v1008_v63 = vadd.f32 %v1006_v47, %v992_v12 }
 0x193   : > { %v1023_v5 = vadd.f32 %v1021_v1, %v1007_v45 }
 0x194   : > { %v1024_v46 = vadd.f32 %v1022_v58, %v1008_v63  ;;  %v1276_v4 = vpop.permute.xlu1 %1275 }
 0x195   : > { %v1025_v60 = vadd.f32 %v1023_v5, %v862_v9  ;;  %v1131_v54 = vpop.permute.xlu0 %1130 }
 0x196   : > { %v1026_v39 = vadd.f32 %v1024_v46, %v863_v41 }
 0x197   : > { %v1033_v44 = vadd.f32 %v1031_v57, %v1025_v60 }
 0x198   : > { %v1034_v48 = vadd.f32 %v1031_v57, %v1026_v39  ;;  %v1282_v49 = vpop.permute.xlu1 %1281 }
 0x199   : > { %v1644_v42 = vmul.f32 -1.442695, %v1033_v44  ;;  %v1298_v47 = vpop.permute.xlu0 %1297 }
 0x19a   : > { %v1645_v24 = vmul.f32 -1.442695, %v1034_v48 }
 0x19b   : > { %1768 = vpow2.f32 %v1644_v42 }
 0x19c   : > { %1770 = vpow2.f32 %v1645_v24  ;;  %v1290_v34 = vpop.permute.xlu1 %1289 }
 0x19d   : > { %v2435_v45 = vpop.permute.xlu0 %1146 }
 0x1a0   : > { %v2429_v25 = vpop.permute.xlu1 %1138 }
 0x1a1   : > { %v2439_v1 = vpop.permute.xlu0 %1313 }
 0x1a4   : > { %v1306_v61 = vpop.permute.xlu1 %1305 }
 0x1a5   : > { %v1769_v19 = vpop.eup %1768  ;;  %v2443_v18 = vpop.permute.xlu0 %1170 }
 0x1a6   : > { %v1771_v35 = vpop.eup %1770  ;;  %v1041_v21 = vadd.f32 1.0, %v1769_v19 }
 0x1a7   : > { %v1042_v50 = vadd.f32 1.0, %v1771_v35 }
 0x1a8   : > { %1772 = vrcp.f32 %v1041_v21 }
 0x1a9   : > { %1774 = vrcp.f32 %v1042_v50  ;;  %v2431_v12 = vpop.permute.xlu1 %1154  ;;  %v2447_v9 = vpop.permute.xlu0 %1337 }
 0x1ae   : > { %v2433_v6 = vpop.permute.xlu1 %1162 }
 0x1b2   : > { %v1773_v31 = vpop.eup %1772  ;;  %v2437_v3 = vpop.permute.xlu1 %1321 }
 0x1b3   : > { %v1775_v36 = vpop.eup %1774  ;;  %v2368_v51 = vmul.f32 %v1773_v31, %v1033_v44 }
 0x1b4   : > { %v2370_v20 = vmul.f32 %v1775_v36, %v1034_v48 }
 0x1b5   : > { %1049 = vrot.lane.b32.xlu1 %v2368_v51, %s1825_s17 }
 0x1b6   : > { %1051 = vrot.lane.b32.xlu0 %v2370_v20, %s1825_s17 }
 0x1b7   : > { %v2441_v63 = vpop.permute.xlu1 %1329 }
 0x1b9   : > { %1057 = vrot.lane.b32.xlu1 %v2368_v51, %s1826_s18 }
 0x1ba   : > { %1059 = vrot.lane.b32.xlu0 %v2370_v20, %s1826_s18 }
 0x1bc   : > { %v2445_v58 = vpop.permute.xlu1 %1178 }
 0x1bd   : > { %1065 = vrot.lane.b32.xlu1 %v2368_v51, %s1827_s19 }
 0x1be   : > { %1075 = vrot.lane.b32.xlu0 %v2370_v20, %s1828_s20 }
 0x1c1   : > { %1067 = vrot.lane.b32.xlu1 %v2370_v20, %s1827_s19 }
 0x1c2   : > { %1081 = vrot.lane.b32.xlu0 %v2368_v51, %s1829_s23 }
 0x1c5   : > { %1073 = vrot.lane.b32.xlu1 %v2368_v51, %s1828_s20 }
 0x1c6   : > { %1091 = vrot.lane.b32.xlu0 %v2370_v20, %s1830_s24 }
 0x1c9   : > { %1083 = vrot.lane.b32.xlu1 %v2370_v20, %s1829_s23 }
 0x1ca   : > { %1105 = vrot.lane.b32.xlu0 %v2368_v51, %s1831_s25 }
 0x1cd   : > { %1089 = vrot.lane.b32.xlu1 %v2368_v51, %s1830_s24 }
 0x1ce   : > { %1188 = vperm.xlu0 %1734, %v1185_v38  }
 0x1d1   : > { %1097 = vrot.lane.b32.xlu1 %v2368_v51, %s1832_s28 }
 0x1d2   : > { %1736 = vset.pattern.permute.xlu0 %v2608_v43 }
 0x1d3   : > { %1224 = vperm.xlu0 %1736, %v1207_v28  }
 0x1d5   : > { %1099 = vrot.lane.b32.xlu1 %v2370_v20, %s1832_s28 }
 0x1d7   : > { %1738 = vset.pattern.permute.xlu0 %v2609_v30 }
 0x1d8   : > { %1240 = vperm.xlu0 %1738, %v1207_v28  }
 0x1d9   : > { %1107 = vrot.lane.b32.xlu1 %v2370_v20, %s1831_s25 }
 0x1dc   : > { %1741 = vset.pattern.permute.xlu0 %v2610_v52 }
 0x1dd   : > { %1348 = vperm.xlu1 %1735, %v1649_v2   ;;  %1417 = vperm.xlu0 %1741, %v1652_v62  }
 0x1e1   : > { %1210 = vperm.xlu1 %1735, %v1207_v28   ;;  %1743 = vset.pattern.permute.xlu0 %v2611_v55 }
 0x1e5   : > { %1371 = vperm.xlu1 %1735, %v1652_v62  }
 0x1e9   : > { %1737 = vset.pattern.permute.xlu1 %v2608_v43 }
 0x1ea   : > { %1385 = vperm.xlu1 %1737, %v1652_v62  }
 0x1ee   : > { %1739 = vset.pattern.permute.xlu1 %v2609_v30 }
 0x1ef   : > { %1401 = vperm.xlu1 %1739, %v1652_v62  }
 0x1f3   : > { %1740 = vset.pattern.permute.xlu1 %v2610_v52 }
 0x1f4   : > { %1256 = vperm.xlu1 %1740, %v1207_v28  }
 0x1f8   : > { %1742 = vset.pattern.permute.xlu1 %v2611_v55 }
 0x1f9   : > { %1437 = vperm.xlu1 %1742, %v1434_v56  }
 0x227   : > { %v1050_v5 = vpop.permute.xlu1 %1049 }
 0x228   : > { %v1052_v41 = vpop.permute.xlu0 %1051 }
 0x229   : > { %v1053_v48 = vsel %vm574_vm1, %v1050_v5, %v1052_v41  ;;  %v1054_v42 = vsel %vm574_vm1, %v1052_v41, %v1050_v5  ;;  %v2612_v41 = vld [vmem:[#allocation9_spill] sm:$0xff] }
 0x22a   : > { %v1055_v35 = vmul.f32 %v1054_v42, %v2205_v10  ;;  %v1056_v21 = vmul.f32 %v1053_v48, %v2213_v23  ;;  %v1308_v42 = vmul.f32 %v1306_v61, %v2368_v51 }
 0x22b   : > { %v1058_v46 = vpop.permute.xlu1 %1057 }
 0x22c   : > { %v1060_v60 = vpop.permute.xlu0 %1059  ;;  %v1278_v2 = vmul.f32 %v1276_v4, %v1055_v35 }
 0x22d   : > { %v1061_v39 = vsel %vm591_vm0, %v1058_v46, %v1060_v60  ;;  %v1062_v57 = vsel %vm591_vm0, %v1060_v60, %v1058_v46  ;;  %v2613_v46 = vld [vmem:[#allocation10_spill] sm:$0xff] }
 0x22e   : > { %v1063_v24 = vmul.f32 %v1062_v57, %v2196_v13  ;;  %v1064_v19 = vmul.f32 %v1061_v39, %v2200_v0  ;;  %v1279_v0 = vmul.f32 %v1276_v4, %v1056_v21 }
 0x22f   : > { %v1066_v44 = vpop.permute.xlu1 %1065 }
 0x230   : > { %v1284_v43 = vmul.f32 %v1282_v49, %v1063_v24  ;;  %v1285_v30 = vmul.f32 %v1282_v49, %v1064_v19  ;;  %v1076_v13 = vpop.permute.xlu0 %1075  ;;  %v1125_v60 = vmul.f32 %v1123_v29, %v1063_v24  ;;  %v1126_v49 = vmul.f32 %v1123_v29, %v1064_v19 }
 0x232   : > { %v1286_v56 = vadd.f32 %v1284_v43, %v1278_v2  ;;  %v1287_v5 = vadd.f32 %v1285_v30, %v1279_v0 }
 0x233   : > { %v1068_v50 = vpop.permute.xlu1 %1067 }
 0x234   : > { %v1069_v31 = vsel %vm608_vm2, %v1066_v44, %v1068_v50  ;;  %v1070_v36 = vsel %vm608_vm2, %v1068_v50, %v1066_v44  ;;  %v1082_v57 = vpop.permute.xlu0 %1081  ;;  %v1309_v50 = vmul.f32 %v1306_v61, %v2370_v20 }
 0x235   : > { %v1071_v38 = vmul.f32 %v1070_v36, %v2217_v33  ;;  %v1072_v28 = vmul.f32 %v1069_v31, %v2221_v14  ;;  %v1119_v31 = vmul.f32 %v2420_v11, %v1055_v35  ;;  %v1120_v36 = vmul.f32 %v2420_v11, %v1056_v21 }
 0x237   : > { %v1074_v62 = vpop.permute.xlu1 %1073  ;;  %v1292_v10 = vmul.f32 %v1290_v34, %v1071_v38  ;;  %v1293_v52 = vmul.f32 %v1290_v34, %v1072_v28  ;;  %v1133_v43 = vmul.f32 %v1131_v54, %v1071_v38  ;;  %v1134_v30 = vmul.f32 %v1131_v54, %v1072_v28 }
 0x238   : > { %v1077_v23 = vsel %vm625_vm3, %v1074_v62, %v1076_v13  ;;  %v1078_v55 = vsel %vm625_vm3, %v1076_v13, %v1074_v62  ;;  %v1127_v24 = vadd.f32 %v1125_v60, %v1119_v31  ;;  %v1128_v29 = vadd.f32 %v1126_v49, %v1120_v36  ;;  %v1092_v54 = vpop.permute.xlu0 %1091 }
 0x239   : > { %v1079_v33 = vmul.f32 %v1078_v55, %v2612_v41  ;;  %v1080_v14 = vmul.f32 %v1077_v23, %v2613_v46  ;;  %v1294_v4 = vadd.f32 %v1292_v10, %v1286_v56  ;;  %v1295_v44 = vadd.f32 %v1293_v52, %v1287_v5 }
 0x23a   : > { %v1135_v11 = vadd.f32 %v1133_v43, %v1127_v24  ;;  %v1136_v21 = vadd.f32 %v1134_v30, %v1128_v29  ;;  %v1149_v5 = vmul.f32 %v2435_v45, %v2368_v51  ;;  %v1150_v41 = vmul.f32 %v2435_v45, %v2370_v20 }
 0x23b   : > { %v1084_v39 = vpop.permute.xlu1 %1083  ;;  %v1300_v48 = vmul.f32 %v1298_v47, %v1079_v33  ;;  %v1301_v34 = vmul.f32 %v1298_v47, %v1080_v14  ;;  %v1141_v0 = vmul.f32 %v2429_v25, %v1079_v33  ;;  %v1142_v62 = vmul.f32 %v2429_v25, %v1080_v14 }
 0x23c   : > { %v1085_v61 = vsel %vm642_vm4, %v1082_v57, %v1084_v39  ;;  %v1086_v35 = vsel %vm642_vm4, %v1084_v39, %v1082_v57 }
 0x23d   : > { %v1302_v13 = vadd.f32 %v1300_v48, %v1294_v4  ;;  %v1303_v2 = vadd.f32 %v1301_v34, %v1295_v44  ;;  %v1143_v23 = vadd.f32 %v1141_v0, %v1135_v11  ;;  %v1144_v25 = vadd.f32 %v1142_v62, %v1136_v21  ;;  %v1106_v4 = vpop.permute.xlu0 %1105 }
 0x23e   : > { %v1087_v55 = vmul.f32 %v1085_v61, %v2265_v32  ;;  %v1088_v56 = vmul.f32 %v1086_v35, %v2269_v59 }
 0x23f   : > { %v1090_v19 = vpop.permute.xlu1 %1089  ;;  %v1311_v47 = vadd.f32 %v1309_v50, %v1303_v2  ;;  %v1310_v10 = vadd.f32 %v1308_v42, %v1302_v13  ;;  %v1152_v60 = vadd.f32 %v1150_v41, %v1144_v25  ;;  %v1151_v49 = vadd.f32 %v1149_v5, %v1143_v23 }
 0x240   : > { %v1093_v38 = vsel %vm659_vm5, %v1090_v19, %v1092_v54  ;;  %v1094_v28 = vsel %vm659_vm5, %v1092_v54, %v1090_v19  ;;  %v1157_v39 = vmul.f32 %v2431_v12, %v1087_v55  ;;  %v1158_v57 = vmul.f32 %v2431_v12, %v1088_v56 }
 0x241   : > { %v1095_v33 = vmul.f32 %v1093_v38, %v2280_v53  ;;  %v1096_v46 = vmul.f32 %v1094_v28, %v2284_v27  ;;  %v1317_v2 = vmul.f32 %v2439_v1, %v1088_v56 }
 0x242   : > { %v1159_v44 = vadd.f32 %v1157_v39, %v1151_v49  ;;  %v1160_v48 = vadd.f32 %v1158_v57, %v1152_v60 }
 0x243   : > { %v1098_v52 = vpop.permute.xlu1 %1097  ;;  %v1165_v51 = vmul.f32 %v2433_v6, %v1095_v33  ;;  %v1166_v20 = vmul.f32 %v2433_v6, %v1096_v46  ;;  %v1324_v19 = vmul.f32 %v2437_v3, %v1095_v33  ;;  %v1325_v0 = vmul.f32 %v2437_v3, %v1096_v46 }
 0x244   : > { %v1319_v61 = vadd.f32 %v1317_v2, %v1311_v47 }
 0x245   : > { %v1167_v31 = vadd.f32 %v1165_v51, %v1159_v44  ;;  %v1168_v6 = vadd.f32 %v1166_v20, %v1160_v48 }
 0x246   : > { %v1327_v38 = vadd.f32 %v1325_v0, %v1319_v61 }
 0x247   : > { %v1100_v14 = vpop.permute.xlu1 %1099 }
 0x248   : > { %v1101_v32 = vsel %vm676_vm6, %v1098_v52, %v1100_v14  ;;  %v1102_v59 = vsel %vm676_vm6, %v1100_v14, %v1098_v52 }
 0x249   : > { %v1103_v53 = vmul.f32 %v1101_v32, %v2289_v40  ;;  %v1104_v27 = vmul.f32 %v1102_v59, %v2303_v37 }
 0x24b   : > { %v1108_v45 = vpop.permute.xlu1 %1107  ;;  %v1173_v12 = vmul.f32 %v2443_v18, %v1103_v53  ;;  %v1174_v34 = vmul.f32 %v2443_v18, %v1104_v27  ;;  %v1316_v18 = vmul.f32 %v2439_v1, %v1087_v55  ;;  %v1332_v35 = vmul.f32 %v2441_v63, %v1103_v53 }
 0x24c   : > { %v1109_v42 = vsel %vm693_vm7, %v1106_v4, %v1108_v45  ;;  %v1110_v50 = vsel %vm693_vm7, %v1108_v45, %v1106_v4 }
 0x24d   : > { %v1111_v40 = vmul.f32 %v1109_v42, %v2310_v26  ;;  %v1112_v37 = vmul.f32 %v1110_v50, %v2314_v7  ;;  %v1175_v30 = vadd.f32 %v1173_v12, %v1167_v31  ;;  %v1176_v13 = vadd.f32 %v1174_v34, %v1168_v6  ;;  %v1189_v24 = vpop.permute.xlu0 %1188 }
 0x24e   : > { %v1318_v7 = vadd.f32 %v1316_v18, %v1310_v10 }
 0x24f   : > { %v1181_v36 = vmul.f32 %v2445_v58, %v1111_v40  ;;  %v1182_v43 = vmul.f32 %v2445_v58, %v1112_v37  ;;  %v1333_v58 = vmul.f32 %v2441_v63, %v1104_v27  ;;  %v1340_v1 = vmul.f32 %v2447_v9, %v1111_v40 }
 0x250   : > { %v1326_v54 = vadd.f32 %v1324_v19, %v1318_v7  ;;  %v1341_v28 = vmul.f32 %v2447_v9, %v1112_v37 }
 0x251   : > { %v1183_v29 = vadd.f32 %v1181_v36, %v1175_v30  ;;  %v1184_v8 = vadd.f32 %v1182_v43, %v1176_v13  ;;  %v1335_v52 = vadd.f32 %v1333_v58, %v1327_v38 }
 0x252   : > { %v1334_v3 = vadd.f32 %v1332_v35, %v1326_v54  ;;  %v1225_v44 = vpop.permute.xlu0 %1224 }
 0x253   : > { %v1191_v26 = vadd.f32 %v1189_v24, %v1183_v29  ;;  %v1192_v62 = vadd.f32 %v1189_v24, %v1184_v8  ;;  %v1343_v23 = vadd.f32 %v1341_v28, %v1335_v52 }
 0x254   : > { %v1342_v25 = vadd.f32 %v1340_v1, %v1334_v3 }
 0x255   : > { %v1646_v11 = vmul.f32 -1.442695, %v1191_v26  ;;  %v1647_v21 = vmul.f32 -1.442695, %v1192_v62 }
 0x257   : > { %1776 = vpow2.f32 %v1646_v11  ;;  %v1241_v30 = vpop.permute.xlu0 %1240 }
 0x258   : > { %1778 = vpow2.f32 %v1647_v21 }
 0x25c   : > { %v1349_v10 = vpop.permute.xlu1 %1348  ;;  %v1418_v28 = vpop.permute.xlu0 %1417 }
 0x25d   : > { %v1351_v47 = vadd.f32 %v1349_v10, %v1342_v25  ;;  %v1352_v55 = vadd.f32 %v1349_v10, %v1343_v23 }
 0x25f   : > { %v1650_v56 = vmul.f32 -1.442695, %v1351_v47  ;;  %v1651_v5 = vmul.f32 -1.442695, %v1352_v55 }
 0x260   : > { %v1211_v9 = vpop.permute.xlu1 %1210 }
 0x261   : > { %1780 = vpow2.f32 %v1650_v56  ;;  %v1777_v63 = vpop.eup %1776 }
 0x262   : > { %1782 = vpow2.f32 %v1651_v5  ;;  %v1779_v41 = vpop.eup %1778  ;;  %v1199_v33 = vadd.f32 1.0, %v1777_v63 }
 0x263   : > { %v1200_v46 = vadd.f32 1.0, %v1779_v41 }
 0x264   : > { %1784 = vrcp.f32 %v1199_v33  ;;  %v1372_v57 = vpop.permute.xlu1 %1371 }
 0x265   : > { %1786 = vrcp.f32 %v1200_v46 }
 0x269   : > { %v1386_v53 = vpop.permute.xlu1 %1385 }
 0x26b   : > { %v1781_v14 = vpop.eup %1780 }
 0x26c   : > { %v1783_v60 = vpop.eup %1782  ;;  %v1359_v49 = vadd.f32 1.0, %v1781_v14 }
 0x26d   : > { %v1360_v39 = vadd.f32 1.0, %v1783_v60 }
 0x26e   : > { %1788 = vrcp.f32 %v1359_v49  ;;  %v1785_v32 = vpop.eup %1784  ;;  %v1402_v6 = vpop.permute.xlu1 %1401 }
 0x26f   : > { %1790 = vrcp.f32 %v1360_v39  ;;  %v1787_v59 = vpop.eup %1786  ;;  %v1205_v51 = vmul.f32 %v1785_v32, %v1191_v26 }
 0x270   : > { %v1206_v20 = vmul.f32 %v1787_v59, %v1192_v62 }
 0x271   : > { %v1216_v27 = vrot.slane %v1205_v51, %v1955_v15  ;;  %v1230_v45 = vrot.slane %v1205_v51, %v1957_v16  ;;  %v1246_v36 = vrot.slane %v1205_v51, %v1959_v17  ;;  %v1262_v2 = vrot.slane %v1205_v51, %v1965_v22 }
 0x272   : > { %v1220_v4 = vrot.slane %v1206_v20, %v1955_v15  ;;  %v1234_v48 = vrot.slane %v1206_v20, %v1957_v16  ;;  %v1250_v13 = vrot.slane %v1206_v20, %v1959_v17  ;;  %v1266_v18 = vrot.slane %v1206_v20, %v1965_v22 }
 0x273   : > { %v1221_v12 = vmul.f32 %v1216_v27, %v1211_v9  ;;  %v1235_v34 = vmul.f32 %v1230_v45, %v1225_v44  ;;  %v1251_v58 = vmul.f32 %v1246_v36, %v1241_v30  ;;  %v1257_v1 = vpop.permute.xlu1 %1256 }
 0x274   : > { %v1222_v50 = vmul.f32 %v1220_v4, %v1211_v9  ;;  %v1236_v31 = vmul.f32 %v1234_v48, %v1225_v44  ;;  %v1252_v38 = vmul.f32 %v1250_v13, %v1241_v30  ;;  %v1267_v5 = vmul.f32 %v1262_v2, %v1257_v1  ;;  %v2615_v13 = vld [vmem:[#allocation3_spill] sm:$0xff] }
 0x275   : > { %v1237_v8 = vadd.f32 %v1235_v34, %v1221_v12  ;;  %v1268_v33 = vmul.f32 %v1266_v18, %v1257_v1 }
 0x276   : > { %v1238_v62 = vadd.f32 %v1236_v31, %v1222_v50 }
 0x277   : > { %v1253_v25 = vadd.f32 %v1251_v58, %v1237_v8 }
 0x278   : > { %v1789_v42 = vpop.eup %1788  ;;  %v1438_v39 = vpop.permute.xlu1 %1437 }
 0x279   : > { %v1791_v40 = vpop.eup %1790  ;;  %v1365_v37 = vmul.f32 %v1789_v42, %v1351_v47  ;;  %v1269_v9 = vadd.f32 %v1267_v5, %v1253_v25 }
 0x27a   : > { %v1366_v43 = vmul.f32 %v1791_v40, %v1352_v55  ;;  %v1254_v55 = vadd.f32 %v1252_v38, %v1238_v62  ;;  %v2619_v38 = vld [vmem:[#allocation8_spill] sm:$0xff] }
 0x27b   : > { %v1377_v24 = vrot.slane %v1365_v37, %v1955_v15  ;;  %v1391_v29 = vrot.slane %v1365_v37, %v1957_v16  ;;  %v1407_v19 = vrot.slane %v1365_v37, %v1959_v17  ;;  %v1423_v11 = vrot.slane %v1365_v37, %v1965_v22 }
 0x27c   : > { %v1381_v0 = vrot.slane %v1366_v43, %v1955_v15  ;;  %v1395_v26 = vrot.slane %v1366_v43, %v1957_v16  ;;  %v1411_v7 = vrot.slane %v1366_v43, %v1959_v17  ;;  %v1427_v52 = vrot.slane %v1366_v43, %v1965_v22  ;;  %v2614_v43 = vld [vmem:[#allocation2_spill] sm:$0xff] }
 0x27d   : > { %v1382_v61 = vmul.f32 %v1377_v24, %v1372_v57  ;;  %v1396_v35 = vmul.f32 %v1391_v29, %v1386_v53  ;;  %v1412_v23 = vmul.f32 %v1407_v19, %v1402_v6  ;;  %v1428_v63 = vmul.f32 %v1423_v11, %v1418_v28 }
 0x27e   : > { %v1383_v21 = vmul.f32 %v1381_v0, %v1372_v57  ;;  %v1397_v54 = vmul.f32 %v1395_v26, %v1386_v53  ;;  %v1413_v47 = vmul.f32 %v1411_v7, %v1402_v6  ;;  %v1429_v46 = vmul.f32 %v1427_v52, %v1418_v28  ;;  %v2616_v0 = vld [vmem:[#allocation4_spill] sm:$0xff] }
 0x27f   : > { %v1398_v3 = vadd.f32 %v1396_v35, %v1382_v61  ;;  %v1270_v60 = vadd.f32 %v1268_v33, %v1254_v55 }
 0x280   : > { %v1399_v10 = vadd.f32 %v1397_v54, %v1383_v21  ;;  %v2618_v21 = vld [vmem:[#allocation7_spill] sm:$0xff] }
 0x281   : > { %v1414_v56 = vadd.f32 %v1412_v23, %v1398_v3 }
 0x282   : > { %v1415_v41 = vadd.f32 %v1413_v47, %v1399_v10 }
 0x283   : > { %v1430_v14 = vadd.f32 %v1428_v63, %v1414_v56 }
 0x284   : > { %v1431_v49 = vadd.f32 %v1429_v46, %v1415_v41 }
 0x285   : > { %v1432_v57 = vadd.f32 %v1430_v14, %v1269_v9 }
 0x286   : > { %v1433_v32 = vadd.f32 %v1431_v49, %v1270_v60 }
 0x287   : > { %v1440_v59 = vadd.f32 %v1438_v39, %v1432_v57 }
 0x288   : > { %v1441_v51 = vadd.f32 %v1438_v39, %v1433_v32 }
 0x289   : > { %v1653_v20 = vmul.f32 -1.442695, %v1440_v59 }
 0x28a   : > { %v1654_v53 = vmul.f32 -1.442695, %v1441_v51 }
 0x28b   : > { %1792 = vpow2.f32 %v1653_v20 }
 0x28c   : > { %1794 = vpow2.f32 %v1654_v53 }
 0x295   : > { %v1793_v27 = vpop.eup %1792 }
 0x296   : > { %v1795_v45 = vpop.eup %1794  ;;  %v1448_v4 = vadd.f32 1.0, %v1793_v27 }
 0x297   : > { %v1449_v44 = vadd.f32 1.0, %v1795_v45 }
 0x298   : > { %1796 = vrcp.f32 %v1448_v4 }
 0x299   : > { %1798 = vrcp.f32 %v1449_v44 }
 0x2a2   : > { %v1797_v48 = vpop.eup %1796 }
 0x2a3   : > { %v1799_v12 = vpop.eup %1798  ;;  %v1454_v34 = vmul.f32 %v1797_v48, %v1440_v59 }
 0x2a4   : > { %v1455_v42 = vmul.f32 %v1799_v12, %v1441_v51 }
 0x2a5   : > { %v1505_v50 = vrot.slane %v1454_v34, %v1955_v15  ;;  %v1515_v31 = vrot.slane %v1454_v34, %v1957_v16  ;;  %v1527_v6 = vrot.slane %v1454_v34, %v1959_v17  ;;  %v1539_v2 = vrot.slane %v1454_v34, %v1965_v22 }
 0x2a6   : > { %v1509_v40 = vrot.slane %v1455_v42, %v1955_v15  ;;  %v1519_v37 = vrot.slane %v1455_v42, %v1957_v16  ;;  %v1531_v36 = vrot.slane %v1455_v42, %v1959_v17  ;;  %v1543_v8 = vrot.slane %v1455_v42, %v1965_v22  ;;  %v2617_v17 = vld [vmem:[#allocation5_spill] sm:$0xff]  ;;  %v2620_v22 = vld [vmem:[#allocation6_spill] sm:$0xff] }
 0x2a7   : > { %v1510_v30 = vmul.f32 %v1505_v50, %v2614_v43  ;;  %v1520_v18 = vmul.f32 %v1515_v31, %v2615_v13  ;;  %v1532_v26 = vmul.f32 %v1527_v6, %v2616_v0  ;;  %v1544_v7 = vmul.f32 %v1539_v2, %v2617_v17 }
 0x2a8   : > { %v1511_v24 = vmul.f32 %v1509_v40, %v2614_v43  ;;  %v1521_v29 = vmul.f32 %v1519_v37, %v2615_v13  ;;  %v1533_v16 = vmul.f32 %v1531_v36, %v2616_v0  ;;  %v1545_v35 = vmul.f32 %v1543_v8, %v2617_v17 }
 0x2a9   : > { %v1522_v19 = vadd.f32 %v1520_v18, %v1510_v30 }
 0x2aa   : > { %v1523_v15 = vadd.f32 %v1521_v29, %v1511_v24 }
 0x2ab   : > { %v1534_v62 = vadd.f32 %v1532_v26, %v1522_v19 }
 0x2ac   : > { %v1535_v61 = vadd.f32 %v1533_v16, %v1523_v15 }
 0x2ad   : > { %v1546_v58 = vadd.f32 %v1544_v7, %v1534_v62 }
 0x2ae   : > { %v1547_v11 = vadd.f32 %v1545_v35, %v1535_v61 }
 0x2af   : > { %v1548_v54 = vadd.f32 %v1546_v58, %v2618_v21 }
 0x2b0   : > { %v1549_v1 = vadd.f32 %v1547_v11, %v2619_v38 }
 0x2b1   : > { %v1550_v28 = vadd.f32 %v1548_v54, %v2620_v22 }
 0x2b2   : > { %v1551_v52 = vadd.f32 %v1549_v1, %v2620_v22 }
 0x2b3   : > { %v1655_v3 = vmul.f32 -1.442695, %v1550_v28 }
 0x2b4   : > { %v1656_v23 = vmul.f32 -1.442695, %v1551_v52 }
 0x2b5   : > { %1800 = vpow2.f32 %v1655_v3 }
 0x2b6   : > { %1802 = vpow2.f32 %v1656_v23 }
 0x2bf   : > { %v1801_v25 = vpop.eup %1800 }
 0x2c0   : > { %v1803_v10 = vpop.eup %1802  ;;  %v1558_v47 = vadd.f32 1.0, %v1801_v25 }
 0x2c1   : > { %v1559_v55 = vadd.f32 1.0, %v1803_v10 }
 0x2c2   : > { %1804 = vrcp.f32 %v1558_v47 }
 0x2c3   : > { %1806 = vrcp.f32 %v1559_v55 }
 0x2cc   : > { %v1805_v56 = vpop.eup %1804 }
 0x2cd   : > { %v1807_v5 = vpop.eup %1806  ;;  %v1564_v63 = vmul.f32 %v1805_v56, %v1550_v28 }
 0x2ce   : > { %v1565_v41 = vmul.f32 %v1807_v5, %v1551_v52 }
 0x2d0   : > { %v1568_v33 = vcombine.low %v1564_v63, %v1565_v41 }
 0x2d2   : > { %1570 = vst [vmem:[%s413_s16] sm:$0xff] %v1568_v33 }
 0x2d3 PF: > { %s22_s21 = sadd.s32 1, %s1814_s21  }
 0x2d4   : > { %p19_p4 = scmp.ge.s32.totalorder %s22_s21, 4  }
 0x2d6   :  { %21 = sbr.rel (!%p19_p4) target bundleno = 1 (0x1), region = 104 }

</bundles_post_ra>
